<compile_context>
chip_gen: v7x
topology: tpu7x:2x2x1
jax: 0.10.0
libtpu: 0.0.40
codegen_flags: <defaults>
</compile_context>

<pallas_src>
import functools

import jax
import jax.numpy as jnp
from jax.experimental import pallas as pl
from jax.experimental.pallas import tpu as pltpu

NL_PAD = 128   # padded label dim (lane-dense logits tile)


def _round_up(x, m):
    return ((x + m - 1) // m) * m


def _pick_tb(S, S_pad, E):
    """Batch tile size: TB*S ≈ 256 MXU rows, TB a multiple of 8, VMEM-capped."""
    tb = _round_up(max(8, -(-256 // S)), 8)
    # Cap so the double-buffered bf16 activation tile stays ~<= 16 MiB, leaving
    # room for the resident weight/bias/length slabs even on v7x (64 MiB VMEM/TC).
    bytes_per_sample = S_pad * E * 2                       # bf16 row of one sample
    cap = max(8, (16 * 1024 * 1024) // (2 * bytes_per_sample))
    cap = max(8, (cap // 8) * 8)
    return max(8, min(tb, cap))


def _cnn_kernel(x_ref, w_ref, b_ref, len_ref, wf_ref, bf_ref, out_ref, *, S, kh_max):
    """One batch tile (TB samples) per program.

    x_ref  : (TB, S+kh_max-1, E)  bf16  embedded inputs (time zero-padded)
    w_ref  : (kh_max*E, NC)       bf16  stacked conv weights (zero padded taps/cols)
    b_ref  : (1, NC)              f32   stacked conv biases
    len_ref: (1, NC)              i32   valid conv length per column (S - kh + 1)
    wf_ref : (NC, NL_PAD)         bf16  final linear weight (zero padded)
    bf_ref : (1, NL_PAD)          f32   final linear bias   (zero padded)
    out_ref: (TB, NL_PAD)         f32   logits tile
    """
    tb, _, e = x_ref.shape
    nc = w_ref.shape[-1]

    x = x_ref[...]                                              # (TB, S_pad, E) bf16
    # In-VMEM im2col: static shifted slices, one lane-dense (TB*S, kh_max*E) matrix.
    cols = [x[:, d:d + S, :].reshape(tb * S, e) for d in range(kh_max)]
    x_col = jnp.concatenate(cols, axis=-1)                      # (TB*S, KE) bf16

    # Fused conv for ALL kernel heights: single MXU pass, f32 accumulate.
    acc = jnp.dot(x_col, w_ref[...], preferred_element_type=jnp.float32)  # (TB*S, NC)
    act = jnp.maximum(acc + b_ref[...], 0.0)                    # ReLU
    act = act.reshape(tb, S, nc)

    # Zero out time positions past each head's valid conv length (exact under ReLU).
    rows = jax.lax.broadcasted_iota(jnp.int32, (tb, S, nc), 1)
    act = jnp.where(rows < len_ref[...], act, 0.0)

    feat = jnp.max(act, axis=1)                                 # (TB, NC) max-pool over time

    logits = jnp.dot(feat.astype(jnp.bfloat16), wf_ref[...],
                     preferred_element_type=jnp.float32) + bf_ref[...]   # (TB, NL_PAD)
    out_ref[...] = logits


def _pack_params(conv_params, final_w_t, final_b, kernel_heights, S, E, NC):
    """Pack per-head conv weights/biases + final linear into compact, fused slabs."""
    nk = len(kernel_heights)
    kh_max = max(kernel_heights)
    C = conv_params[0][0].shape[-1]
    n_labels = final_w_t.shape[-1]
    KE = kh_max * E

    w_stack = jnp.zeros((KE, NC), jnp.float32)
    b_stack = jnp.zeros((1, NC), jnp.float32)
    lens = jnp.full((1, NC), S, jnp.int32)        # pad columns: value irrelevant (act==0)
    wf_pad = jnp.zeros((NC, NL_PAD), jnp.float32)
    for i, ((w, b), kh) in enumerate(zip(conv_params, kernel_heights)):
        col0 = i * C                               # compact packing, no per-head 128 pad
        for dh in range(kh):
            w_stack = w_stack.at[dh * E:(dh + 1) * E, col0:col0 + C].set(w[dh])
        b_stack = b_stack.at[0, col0:col0 + C].set(b[0])
        lens = lens.at[0, col0:col0 + C].set(S - kh + 1)
        wf_pad = wf_pad.at[col0:col0 + C, :n_labels].set(final_w_t[i * C:(i + 1) * C, :])
    bf_pad = jnp.zeros((1, NL_PAD), jnp.float32).at[0, :n_labels].set(final_b[0])
    return (w_stack.astype(jnp.bfloat16), b_stack, lens,
            wf_pad.astype(jnp.bfloat16), bf_pad)


def cnn_model_forward(input_ids, emb_table, conv_params, final_w_t, final_b,
                      kernel_heights, tb=None):
    """conv_params: list of (w_khEC, b_1C) per kernel height (PyTorch eval forward)."""
    # Embedding lookup; dropout is identity in eval mode.
    # TODO(synk): fuse this gather into the kernel via PrefetchScalarGridSpec.
    x = emb_table[input_ids].astype(jnp.float32)                # (B, S, E)
    B, S, E = x.shape
    nk = len(kernel_heights)
    kh_max = max(kernel_heights)
    C = conv_params[0][0].shape[-1]
    n_labels = final_w_t.shape[-1]
    KE = kh_max * E
    NC = _round_up(nk * C, 128)
    S_pad = S + kh_max - 1

    if tb is None:
        tb = _pick_tb(S, S_pad, E)
    B_pad = _round_up(B, tb)

    # Pad time (for the in-kernel im2col taps) and batch (tile remainder); bf16 feed.
    x_pad = jnp.pad(x, ((0, B_pad - B), (0, kh_max - 1), (0, 0))).astype(jnp.bfloat16)

    w_stack, b_stack, lens, wf_pad, bf_pad = _pack_params(
        conv_params, final_w_t, final_b, kernel_heights, S, E, NC)

    kernel = functools.partial(_cnn_kernel, S=S, kh_max=kh_max)

    flops = int(2 * B_pad * S * KE * NC + 2 * B_pad * NC * NL_PAD)
    bytes_accessed = int(x_pad.size * 2 + w_stack.size * 2 + b_stack.size * 4
                         + lens.size * 4 + wf_pad.size * 2 + bf_pad.size * 4
                         + B_pad * NL_PAD * 4)

    out = pl.pallas_call(
        kernel,
        out_shape=jax.ShapeDtypeStruct((B_pad, NL_PAD), jnp.float32),
        grid=(B_pad // tb,),
        in_specs=[
            pl.BlockSpec((tb, S_pad, E), lambda b: (b, 0, 0)),   # activations (batch-tiled)
            pl.BlockSpec((KE, NC), lambda b: (0, 0)),            # fused conv weights
            pl.BlockSpec((1, NC), lambda b: (0, 0)),             # conv biases
            pl.BlockSpec((1, NC), lambda b: (0, 0)),             # per-column valid lengths
            pl.BlockSpec((NC, NL_PAD), lambda b: (0, 0)),        # classifier weights
            pl.BlockSpec((1, NL_PAD), lambda b: (0, 0)),         # classifier bias
        ],
        out_specs=pl.BlockSpec((tb, NL_PAD), lambda b: (b, 0)),
        compiler_params=pltpu.CompilerParams(
            dimension_semantics=("parallel",),
            vmem_limit_bytes=32 * 1024 * 1024),
        cost_estimate=pl.CostEstimate(flops=flops, transcendentals=0,
                                      bytes_accessed=bytes_accessed),
    )(x_pad, w_stack, b_stack, lens, wf_pad, bf_pad)

    return out[:B, :n_labels]


def _ref_forward(input_ids, emb_table, conv_params, final_w_t, final_b,
                 kernel_heights):
    """Pure-JAX reference of the PyTorch forward (eval mode), using the same bf16
    quantization of activations / conv weights / classifier inputs as the kernel."""
    x = emb_table[input_ids].astype(jnp.bfloat16).astype(jnp.float32)
    outs = []
    for (w, b), kh in zip(conv_params, kernel_heights):
        wq = w.astype(jnp.bfloat16).astype(jnp.float32)
        L = x.shape[1] - kh + 1
        acc = jnp.zeros((x.shape[0], L, w.shape[-1]), jnp.float32)
        for dh in range(kh):
            acc = acc + jnp.einsum('ble,ec->blc', x[:, dh:dh + L, :], wq[dh],
                                   precision=jax.lax.Precision.HIGHEST)
        act = jnp.maximum(acc + b[None], 0.0)
        outs.append(jnp.max(act, axis=1))
    feat = jnp.concatenate(outs, axis=1)
    featq = feat.astype(jnp.bfloat16).astype(jnp.float32)
    wfq = final_w_t.astype(jnp.bfloat16).astype(jnp.float32)
    return jnp.dot(featq, wfq, precision=jax.lax.Precision.HIGHEST) + final_b


if __name__ == "__main__":
    # Small shapes consistent with the module.
    B, S = 2, 16                 # batch, sequence length
    V, E = 50, 32                # vocab size, embedding_dim
    C = 8                        # out_channels (in_channels = 1)
    kernel_heights = (3, 4, 5)
    n_labels = 2

    key = jax.random.PRNGKey(0)
    k_ids, k_emb, k_f, *k_conv = jax.random.split(key, 3 + 2 * len(kernel_heights))

    input_ids = jax.random.randint(k_ids, (B, S), 0, V, dtype=jnp.int32)
    emb_table = jax.random.normal(k_emb, (V, E), dtype=jnp.float32) * 0.1

    # Conv2d weights: PyTorch shape (C, 1, kh, E) -> stored here as (kh, E, C).
    conv_params = []
    for i, kh in enumerate(kernel_heights):
        w = jax.random.normal(k_conv[2 * i], (kh, E, C), dtype=jnp.float32) * 0.1
        b = jax.random.normal(k_conv[2 * i + 1], (1, C), dtype=jnp.float32) * 0.1
        conv_params.append((w, b))

    # Final Linear: PyTorch weight (n_labels, nk*C) -> stored transposed.
    kf_w, kf_b = jax.random.split(k_f)
    final_w_t = jax.random.normal(kf_w, (len(kernel_heights) * C, n_labels),
                                  dtype=jnp.float32) * 0.1
    final_b = jax.random.normal(kf_b, (1, n_labels), dtype=jnp.float32) * 0.1

    logits = cnn_model_forward(input_ids, emb_table, conv_params,
                               final_w_t, final_b, kernel_heights)
    logits = jax.block_until_ready(logits)

    ref = _ref_forward(input_ids, emb_table, conv_params,
                       final_w_t, final_b, kernel_heights)
    assert logits.shape == (B, n_labels), logits.shape
    assert jnp.allclose(logits, ref, atol=5e-3, rtol=5e-3), (
        jnp.max(jnp.abs(logits - ref)))

    print("KERNEL_OK")
</pallas_src>

<mosaic_0001>
module attributes {stable_mosaic.version = 11 : i64} {
  func.func @_cnn_kernel(%arg0: i32, %arg1: memref<16x20x32xbf16, #tpu.memory_space<vmem>>, %arg2: memref<160x128xbf16, #tpu.memory_space<vmem>>, %arg3: memref<1x128xf32, #tpu.memory_space<vmem>>, %arg4: memref<1x128xi32, #tpu.memory_space<vmem>>, %arg5: memref<128x128xbf16, #tpu.memory_space<vmem>>, %arg6: memref<1x128xf32, #tpu.memory_space<vmem>>, %arg7: memref<16x128xf32, #tpu.memory_space<vmem>>) attributes {dimension_semantics = [#tpu.dimension_semantics<parallel>], iteration_bounds = array<i64: 1>, scalar_prefetch = 0 : i64, scratch_operands = 0 : i64, tpu.core_type = #tpu.core_type<tc>, window_params = [{transform_indices = @transform_0, window_bounds = array<i64: 16, 20, 32>}, {pipeline_mode = #tpu.pipeline_mode<synchronous>, transform_indices = @transform_1, window_bounds = array<i64: 160, 128>}, {pipeline_mode = #tpu.pipeline_mode<synchronous>, transform_indices = @transform_2, window_bounds = array<i64: 1, 128>}, {pipeline_mode = #tpu.pipeline_mode<synchronous>, transform_indices = @transform_3, window_bounds = array<i64: 1, 128>}, {pipeline_mode = #tpu.pipeline_mode<synchronous>, transform_indices = @transform_4, window_bounds = array<i64: 128, 128>}, {pipeline_mode = #tpu.pipeline_mode<synchronous>, transform_indices = @transform_5, window_bounds = array<i64: 1, 128>}, {transform_indices = @transform_6, window_bounds = array<i64: 16, 128>}]} {
    %c0 = arith.constant 0 : index
    %c0_0 = arith.constant 0 : index
    %c0_1 = arith.constant 0 : index
    %0 = vector.load %arg1[%c0, %c0_0, %c0_1] : memref<16x20x32xbf16, #tpu.memory_space<vmem>>, vector<16x20x32xbf16>
    %1 = vector.extract_strided_slice %0 {offsets = [0, 0, 0], sizes = [16, 16, 32], strides = [1, 1, 1]} : vector<16x20x32xbf16> to vector<16x16x32xbf16>
    %2 = vector.shape_cast %1 : vector<16x16x32xbf16> to vector<256x32xbf16>
    %3 = vector.extract_strided_slice %0 {offsets = [0, 1, 0], sizes = [16, 16, 32], strides = [1, 1, 1]} : vector<16x20x32xbf16> to vector<16x16x32xbf16>
    %4 = vector.shape_cast %3 : vector<16x16x32xbf16> to vector<256x32xbf16>
    %5 = vector.extract_strided_slice %0 {offsets = [0, 2, 0], sizes = [16, 16, 32], strides = [1, 1, 1]} : vector<16x20x32xbf16> to vector<16x16x32xbf16>
    %6 = vector.shape_cast %5 : vector<16x16x32xbf16> to vector<256x32xbf16>
    %7 = vector.extract_strided_slice %0 {offsets = [0, 3, 0], sizes = [16, 16, 32], strides = [1, 1, 1]} : vector<16x20x32xbf16> to vector<16x16x32xbf16>
    %8 = vector.shape_cast %7 : vector<16x16x32xbf16> to vector<256x32xbf16>
    %9 = vector.extract_strided_slice %0 {offsets = [0, 4, 0], sizes = [16, 16, 32], strides = [1, 1, 1]} : vector<16x20x32xbf16> to vector<16x16x32xbf16>
    %10 = vector.shape_cast %9 : vector<16x16x32xbf16> to vector<256x32xbf16>
    %11 = tpu.concatenate %2, %4, %6, %8, %10 in 1 : vector<256x32xbf16>, vector<256x32xbf16>, vector<256x32xbf16>, vector<256x32xbf16>, vector<256x32xbf16> -> vector<256x160xbf16>
    %c0_2 = arith.constant 0 : index
    %c0_3 = arith.constant 0 : index
    %12 = vector.load %arg2[%c0_2, %c0_3] : memref<160x128xbf16, #tpu.memory_space<vmem>>, vector<160x128xbf16>
    %cst = arith.constant dense<0.000000e+00> : vector<256x128xf32>
    %13 = tpu.matmul %11, %12, %cst {dimension_numbers = #tpu.dot_dimension_numbers<[1], [0], [0], [1], [0, 0, 1, 1], [], []>} : vector<256x160xbf16>, vector<160x128xbf16>, vector<256x128xf32> -> vector<256x128xf32>
    %c0_4 = arith.constant 0 : index
    %c0_5 = arith.constant 0 : index
    %14 = vector.load %arg3[%c0_4, %c0_5] : memref<1x128xf32, #tpu.memory_space<vmem>>, vector<1x128xf32>
    %15 = vector.broadcast %14 : vector<1x128xf32> to vector<256x128xf32>
    %16 = arith.addf %13, %15 : vector<256x128xf32>
    %cst_6 = arith.constant 0.000000e+00 : f32
    %17 = vector.broadcast %cst_6 : f32 to vector<256x128xf32>
    %18 = arith.maximumf %16, %17 : vector<256x128xf32>
    %19 = vector.shape_cast %18 : vector<256x128xf32> to vector<16x16x128xf32>
    %20 = tpu.iota {dimensions = array<i32: 1>} : vector<16x16x128xi32>
    %c0_7 = arith.constant 0 : index
    %c0_8 = arith.constant 0 : index
    %21 = vector.load %arg4[%c0_7, %c0_8] : memref<1x128xi32, #tpu.memory_space<vmem>>, vector<1x128xi32>
    %22 = vector.shape_cast %21 : vector<1x128xi32> to vector<1x1x128xi32>
    %23 = vector.broadcast %22 : vector<1x1x128xi32> to vector<16x16x128xi32>
    %24 = arith.cmpi slt, %20, %23 : vector<16x16x128xi32>
    %cst_9 = arith.constant 0.000000e+00 : f32
    %25 = vector.broadcast %cst_9 : f32 to vector<16x16x128xf32>
    %26 = arith.select %24, %19, %25 : vector<16x16x128xi1>, vector<16x16x128xf32>
    %cst_10 = arith.constant dense<0xFF800000> : vector<16x128xf32>
    %27 = vector.multi_reduction <maximumf>, %26, %cst_10 [1] : vector<16x16x128xf32> to vector<16x128xf32>
    %28 = arith.truncf %27 : vector<16x128xf32> to vector<16x128xbf16>
    %c0_11 = arith.constant 0 : index
    %c0_12 = arith.constant 0 : index
    %29 = vector.load %arg5[%c0_11, %c0_12] : memref<128x128xbf16, #tpu.memory_space<vmem>>, vector<128x128xbf16>
    %cst_13 = arith.constant dense<0.000000e+00> : vector<16x128xf32>
    %30 = tpu.matmul %28, %29, %cst_13 {dimension_numbers = #tpu.dot_dimension_numbers<[1], [0], [0], [1], [0, 0, 1, 1], [], []>} : vector<16x128xbf16>, vector<128x128xbf16>, vector<16x128xf32> -> vector<16x128xf32>
    %c0_14 = arith.constant 0 : index
    %c0_15 = arith.constant 0 : index
    %31 = vector.load %arg6[%c0_14, %c0_15] : memref<1x128xf32, #tpu.memory_space<vmem>>, vector<1x128xf32>
    %32 = vector.broadcast %31 : vector<1x128xf32> to vector<16x128xf32>
    %33 = arith.addf %30, %32 : vector<16x128xf32>
    %c0_16 = arith.constant 0 : index
    %c0_17 = arith.constant 0 : index
    %34 = vector.load %arg7[%c0_16, %c0_17] : memref<16x128xf32, #tpu.memory_space<vmem>>, vector<16x128xf32>
    tpu.vector_store %arg7[%c0_16, %c0_17], %33 {strides = array<i32>} : memref<16x128xf32, #tpu.memory_space<vmem>>, vector<16x128xf32>,
    return
  }
  func.func @transform_0(%arg0: i32) -> (i32, i32, i32) {
    %c0_i32 = arith.constant 0 : i32
    %c0_i32_0 = arith.constant 0 : i32
    %c0_i32_1 = arith.constant 0 : i32
    return %arg0, %c0_i32, %c0_i32_0 : i32, i32, i32
  }
  func.func @transform_1(%arg0: i32) -> (i32, i32) {
    %c0_i32 = arith.constant 0 : i32
    %c0_i32_0 = arith.constant 0 : i32
    %c0_i32_1 = arith.constant 0 : i32
    return %c0_i32, %c0_i32_0 : i32, i32
  }
  func.func @transform_2(%arg0: i32) -> (i32, i32) {
    %c0_i32 = arith.constant 0 : i32
    %c0_i32_0 = arith.constant 0 : i32
    %c0_i32_1 = arith.constant 0 : i32
    return %c0_i32, %c0_i32_0 : i32, i32
  }
  func.func @transform_3(%arg0: i32) -> (i32, i32) {
    %c0_i32 = arith.constant 0 : i32
    %c0_i32_0 = arith.constant 0 : i32
    %c0_i32_1 = arith.constant 0 : i32
    return %c0_i32, %c0_i32_0 : i32, i32
  }
  func.func @transform_4(%arg0: i32) -> (i32, i32) {
    %c0_i32 = arith.constant 0 : i32
    %c0_i32_0 = arith.constant 0 : i32
    %c0_i32_1 = arith.constant 0 : i32
    return %c0_i32, %c0_i32_0 : i32, i32
  }
  func.func @transform_5(%arg0: i32) -> (i32, i32) {
    %c0_i32 = arith.constant 0 : i32
    %c0_i32_0 = arith.constant 0 : i32
    %c0_i32_1 = arith.constant 0 : i32
    return %c0_i32, %c0_i32_0 : i32, i32
  }
  func.func @transform_6(%arg0: i32) -> (i32, i32) {
    %c0_i32 = arith.constant 0 : i32
    %c0_i32_0 = arith.constant 0 : i32
    return %arg0, %c0_i32 : i32, i32
  }
}

</mosaic_0001>

<bundles_post_ra>
// kernel: tpu_custom_call.1
= control target key start
LH: loop header
LB: loop body
LE: loop exit
PB: predicated region body
PF: predicated region fallthrough
CT: control target
= control target key end

     0   :  { %vm508_vm0 = vcmask 1042432   ;;  %vm509_vm1 = vcmask 1046532   ;;  %s2431_s15 = smov 64   ;;  %vm623_vm3 = vsmask.f32 2304  ;;  %s2432_s16 = smov 96   ;;  %s3916_s0 = inlined_call_operand.vmem [shape: bf16[16,20,32], index: 0, kind: input, shape index: {}]   ;;  %s3917_s1 = inlined_call_operand.vmem [shape: bf16[160,128], index: 1, kind: input, shape index: {}]   ;;  %s3918_s2 = inlined_call_operand.vmem [shape: f32[1,128], index: 2, kind: input, shape index: {}]   ;;  %s3919_s3 = inlined_call_operand.vmem [shape: s32[1,128], index: 3, kind: input, shape index: {}]   ;;  %s3920_s4 = inlined_call_operand.vmem [shape: bf16[128,128], index: 4, kind: input, shape index: {}]   ;;  %s3921_s5 = inlined_call_operand.vmem [shape: f32[1,128], index: 5, kind: input, shape index: {}]   ;;  %s3922_s6 = inlined_call_operand.hbm [shape: f32[16,128], index: 6, kind: output, shape index: {}]  }
   0x1   :  { %v2478_v0 = vld [vmem:[%s3916_s0 + $0x18] sm:$0xf]  ;;  %v2483_v1 = vld [vmem:[%s3916_s0 + $0x1c] sm:$0xf]  ;;  %v2488_v2 = vld [vmem:[%s3916_s0 + $0x20] sm:$0x3] }
   0x2   :  { %v2133_v3 = vrot.slane %v2478_v0, 9  ;;  %v527_v4 = vrot.slane %v2483_v1, 5  ;;  %vm2492_vm2 = vmor %vm508_vm0, %vm509_vm1  ;;  %v530_v6 = vrot.slane %v2488_v2, 5  ;;  %v2500_v7 = vld [vmem:[%s3916_s0] sm:$0xf]  ;;  %s2433_s19 = smov 32  }
   0x3   :  { %v2505_v8 = vld [vmem:[%s3916_s0 + $0x4] sm:$0xf]  ;;  %v2512_v11 = vld [vmem:[%s3916_s0 + $0x8] sm:$0x3]  ;;  %v2131_v12 = vrot.slane %v2500_v7, 9  ;;  %v77_v17 = vshrl.u32 %v2500_v7, 16 }
   0x4   :  { %v528_v9 = vsel %vm2492_vm2, %v2133_v3, %v527_v4  ;;  %v529_v10 = vrot.slane %v527_v4, 4  ;;  %v513_v13 = vrot.slane %v2505_v8, 5  ;;  %v516_v14 = vrot.slane %v2512_v11, 5  ;;  %v2520_v15 = vld [vmem:[%s3916_s0 + $0xc] sm:$0xf] }
   0x5   :  { %v2525_v16 = vld [vmem:[%s3916_s0 + $0x10] sm:$0xf]  ;;  %v2535_v21 = vld [vmem:[%s3916_s0 + $0x14] sm:$0x3]  ;;  %v2132_v22 = vrot.slane %v2520_v15, 9  ;;  %v80_v26 = vshll.u32 %v2500_v7, 16 }
   0x6   :  { %v531_v18 = vsel %vm2492_vm2, %v529_v10, %v530_v6  ;;  %v514_v19 = vsel %vm2492_vm2, %v2131_v12, %v513_v13  ;;  %v515_v20 = vrot.slane %v513_v13, 4  ;;  %v520_v24 = vrot.slane %v2525_v16, 5 }
   0x7   :  { %v2197_v23 = vcombine.low %v528_v9, %v531_v18  ;;  %v523_v25 = vrot.slane %v2535_v21, 5  ;;  %v86_v28 = vshll.u32 %v2505_v8, 16  ;;  %v90_v29 = vshrl.u32 %v2505_v8, 16 }
   0x8   :  { %v517_v27 = vsel %vm2492_vm2, %v515_v20, %v516_v14  ;;  %v96_v30 = vshll.u32 %v2512_v11, 16  ;;  %v521_v32 = vsel %vm2492_vm2, %v2132_v22, %v520_v24  ;;  %v522_v33 = vrot.slane %v520_v24, 4 }
   0x9   :  { %1161 = vrot.lane.b32.xlu1 %v2197_v23, %s2431_s15  ;;  %v2195_v31 = vcombine.low %v514_v19, %v517_v27  ;;  %vm624_vm4 = vsmask.f32 6416  ;;  %v626_v34 = vrot.slane %v77_v17, 5  ;;  %v627_v35 = vrot.slane %v80_v26, 6 }
   0xa   :  { %v630_v36 = vrot.slane %v90_v29, 5  ;;  %v524_v37 = vsel %vm2492_vm2, %v522_v33, %v523_v25  ;;  %v631_v38 = vrot.slane %v86_v28, 6  ;;  %v635_v39 = vshrl.u32 %v2512_v11, 16  ;;  %vm2553_vm7 = vmor %vm623_vm3, %vm624_vm4  ;;  %v2588_v33 = vld [vmem:[%s3916_s0 + $0x6c] sm:$0xf] }
   0xb   :  { %1157 = vrot.lane.b32.xlu0 %v2195_v31, %s2431_s15  ;;  %v638_v40 = vrot.slane %v96_v30, 6  ;;  %v2196_v41 = vcombine.low %v521_v32, %v524_v37  ;;  %v628_v42 = vor.u32 %v627_v35, %v626_v34  ;;  %vm73_vm5 = vsmask.f32 3328 }
   0xc   :  { %vm74_vm6 = vsmask.f32 7440  ;;  %v632_v44 = vor.u32 %v631_v38, %v630_v36  ;;  %v637_v45 = vrot.slane %v635_v39, 5  ;;  %v101_v46 = vshrl.u32 %v2520_v15, 16 }
   0xd   :  { %v104_v47 = vshll.u32 %v2520_v15, 16  ;;  %v629_v48 = vrot.slane %v628_v42, 4  ;;  %v110_v49 = vshll.u32 %v2525_v16, 16  ;;  %v114_v50 = vshrl.u32 %v2525_v16, 16  ;;  %vm2569_vm8 = vmor %vm73_vm5, %vm74_vm6 }
   0xe   :  { %v120_v51 = vshll.u32 %v2535_v21, 16  ;;  %v634_v52 = vrot.slane %v632_v44, 4  ;;  %v639_v53 = vor.u32 %v638_v40, %v637_v45  ;;  %v103_v54 = vrot.slane %v101_v46, 4 }
   0xf   :  { %1159 = vrot.lane.b32.xlu0 %v2196_v41, %s2431_s15  ;;  %v106_v55 = vrot.slane %v104_v47, 5  ;;  %v633_v56 = vsel %vm2553_vm7, %v629_v48, %v632_v44  ;;  %v112_v57 = vrot.slane %v110_v49, 5  ;;  %v116_v58 = vrot.slane %v114_v50, 4  ;;  %v2598_v41 = vld [vmem:[%s3916_s0 + $0x70] sm:$0xf] }
  0x10   :  { %v122_v59 = vrot.slane %v120_v51, 5  ;;  %v640_v60 = vsel %vm2553_vm7, %v634_v52, %v639_v53  ;;  %v79_v62 = vrot.slane %v77_v17, 4  ;;  %v82_v63 = vrot.slane %v80_v26, 5 }
  0x11   :  { %v107_v61 = vor.u32 %v106_v55, %v103_v54  ;;  %v2211_v3 = vcombine.low %v633_v56, %v640_v60  ;;  %v117_v6 = vor.u32 %v116_v58, %v112_v57  ;;  %v88_v7 = vrot.slane %v86_v28, 5 }
  0x12   :  { %v92_v8 = vrot.slane %v90_v29, 4  ;;  %v83_v10 = vor.u32 %v82_v63, %v79_v62  ;;  %v98_v11 = vrot.slane %v96_v30, 5  ;;  %v641_v12 = vrot.slane %v101_v46, 5  ;;  %v2607_v46 = vld [vmem:[%s3916_s0 + $0x74] sm:$0x3] }
  0x13   :  { %v108_v9 = vrot.slane %v107_v61, 4  ;;  %1237 = vrot.lane.b32.xlu1 %v2211_v3, %s2432_s16  ;;  %v118_v13 = vrot.slane %v117_v6, 4  ;;  %v642_v15 = vrot.slane %v104_v47, 6  ;;  %v645_v16 = vrot.slane %v114_v50, 5 }
  0x14   :  { %v93_v14 = vor.u32 %v92_v8, %v88_v7  ;;  %v84_v18 = vrot.slane %v83_v10, 4  ;;  %v646_v19 = vrot.slane %v110_v49, 6  ;;  %v650_v20 = vshrl.u32 %v2535_v21, 16 }
  0x15   :  { %v113_v17 = vsel %vm2569_vm8, %v108_v9, %v112_v57  ;;  %v123_v22 = vsel %vm2569_vm8, %v118_v13, %v122_v59  ;;  %v643_v24 = vor.u32 %v642_v15, %v641_v12  ;;  %v653_v25 = vrot.slane %v120_v51, 6  ;;  %v2630_v12 = vld [vmem:[%s3916_s0 + $0x24] sm:$0xf] }
  0x16   :  { %v94_v23 = vrot.slane %v93_v14, 4  ;;  %v2180_v26 = vcombine.low %v113_v17, %v123_v22  ;;  %v89_v27 = vsel %vm2569_vm8, %v84_v18, %v88_v7  ;;  %v647_v28 = vor.u32 %v646_v19, %v645_v16  ;;  %v2638_v17 = vld [vmem:[%s3916_s0 + $0x28] sm:$0xf] }
  0x17   :  { %v652_v29 = vrot.slane %v650_v20, 5  ;;  %v644_v31 = vrot.slane %v643_v24, 4  ;;  %v125_v32 = vshrl.u32 %v2478_v0, 16  ;;  %v128_v21 = vshll.u32 %v2478_v0, 16 }
  0x18   :  { %v99_v30 = vsel %vm2569_vm8, %v94_v23, %v98_v11  ;;  %1079 = vrot.lane.b32.xlu1 %v2180_v26, %s2433_s19  ;;  %v649_v35 = vrot.slane %v647_v28, 4  ;;  %v134_v37 = vshll.u32 %v2483_v1, 16  ;;  %v138_v0 = vshrl.u32 %v2483_v1, 16 }
  0x19   :  { %v2179_v34 = vcombine.low %v89_v27, %v99_v30  ;;  %v654_v36 = vor.u32 %v653_v25, %v652_v29  ;;  %v648_v38 = vsel %vm2553_vm7, %v644_v31, %v647_v28  ;;  %v127_v39 = vrot.slane %v125_v32, 4  ;;  %v2645_v25 = vld [vmem:[%s3916_s0 + $0x2c] sm:$0x3] }
  0x1a   :  { %v130_v40 = vrot.slane %v128_v21, 5  ;;  %v136_v44 = vrot.slane %v134_v37, 5  ;;  %v144_v45 = vshll.u32 %v2488_v2, 16  ;;  %v293_v1 = vshrl.u32 %v2588_v33, 16 }
  0x1b   :  { %1077 = vrot.lane.b32.xlu0 %v2179_v34, %s2433_s19  ;;  %v655_v42 = vsel %vm2553_vm7, %v649_v35, %v654_v36  ;;  %v140_v49 = vrot.slane %v138_v0, 4  ;;  %v296_v50 = vshll.u32 %v2588_v33, 16  ;;  %v302_v53 = vshll.u32 %v2598_v41, 16 }
  0x1c   :  { %v2212_v47 = vcombine.low %v648_v38, %v655_v42  ;;  %v131_v48 = vor.u32 %v130_v40, %v127_v39  ;;  %v146_v51 = vrot.slane %v144_v45, 5  ;;  %v295_v52 = vrot.slane %v293_v1, 4 }
  0x1d   :  { %v306_v54 = vshrl.u32 %v2598_v41, 16  ;;  %v141_v56 = vor.u32 %v140_v49, %v136_v44  ;;  %v298_v57 = vrot.slane %v296_v50, 5  ;;  %v312_v58 = vshll.u32 %v2607_v46, 16 }
  0x1e   :  { %1239 = vrot.lane.b32.xlu1 %v2212_v47, %s2432_s16  ;;  %v132_v55 = vrot.slane %v131_v48, 4  ;;  %v304_v59 = vrot.slane %v302_v53, 5  ;;  %v656_v61 = vrot.slane %v125_v32, 5  ;;  %v657_v62 = vrot.slane %v128_v21, 6 }
  0x1f   :  { %v308_v60 = vrot.slane %v306_v54, 4  ;;  %v142_v3 = vrot.slane %v141_v56, 4  ;;  %v299_v6 = vor.u32 %v298_v57, %v295_v52  ;;  %v314_v7 = vrot.slane %v312_v58, 5  ;;  %v2678_v56 = vld [vmem:[%s3916_s0 + $0x78] sm:$0xf] }
  0x20   :  { %v137_v63 = vsel %vm2569_vm8, %v132_v55, %v136_v44  ;;  %v658_v9 = vor.u32 %v657_v62, %v656_v61  ;;  %v660_v10 = vrot.slane %v138_v0, 5  ;;  %v661_v11 = vrot.slane %v134_v37, 6 }
  0x21   :  { %v309_v8 = vor.u32 %v308_v60, %v304_v59  ;;  %v147_v13 = vsel %vm2569_vm8, %v142_v3, %v146_v51  ;;  %v300_v14 = vrot.slane %v299_v6, 4  ;;  %v665_v15 = vshrl.u32 %v2488_v2, 16 }
  0x22   :  { %v668_v16 = vrot.slane %v144_v45, 6  ;;  %v2181_v18 = vcombine.low %v137_v63, %v147_v13  ;;  %v659_v20 = vrot.slane %v658_v9, 4  ;;  %v662_v22 = vor.u32 %v661_v11, %v660_v10 }
  0x23   :  { %v310_v19 = vrot.slane %v309_v8, 4  ;;  %v305_v23 = vsel %vm2569_vm8, %v300_v14, %v304_v59  ;;  %v667_v24 = vrot.slane %v665_v15, 5  ;;  %v149_v2 = vshrl.u32 %v2630_v12, 16 }
  0x24   :  { %v152_v26 = vshll.u32 %v2630_v12, 16  ;;  %1081 = vrot.lane.b32.xlu0 %v2181_v18, %s2433_s19  ;;  %v663_v28 = vsel %vm2553_vm7, %v659_v20, %v662_v22  ;;  %v664_v29 = vrot.slane %v662_v22, 4  ;;  %v158_v30 = vshll.u32 %v2638_v17, 16 }
  0x25   :  { %v315_v27 = vsel %vm2569_vm8, %v310_v19, %v314_v7  ;;  %v669_v32 = vor.u32 %v668_v16, %v667_v24  ;;  %v151_v21 = vrot.slane %v149_v2, 4  ;;  %v162_v36 = vshrl.u32 %v2638_v17, 16  ;;  %v2695_v7 = vld [vmem:[%s3916_s0 + $0x7c] sm:$0xf]  ;;  %v2724_v24 = vld [vmem:[%s3916_s0 + $0x30] sm:$0xf] }
  0x26   :  { %v2188_v31 = vcombine.low %v305_v23, %v315_v27  ;;  %v154_v34 = vrot.slane %v152_v26, 5  ;;  %v160_v35 = vrot.slane %v158_v30, 5  ;;  %v168_v37 = vshll.u32 %v2645_v25, 16 }
  0x27   :  { %v2140_v38 = vrot.slane %v2588_v33, 9  ;;  %v670_v39 = vsel %vm2553_vm7, %v664_v29, %v669_v32  ;;  %v576_v0 = vrot.slane %v2598_v41, 5  ;;  %v579_v42 = vrot.slane %v2607_v46, 5  ;;  %v2700_v33 = vld [vmem:[%s3916_s0 + $0x80] sm:$0x3] }
  0x28   :  { %1095 = vrot.lane.b32.xlu1 %v2188_v31, %s2433_s19  ;;  %v155_v40 = vor.u32 %v154_v34, %v151_v21  ;;  %v2213_v44 = vcombine.low %v663_v28, %v670_v39  ;;  %v164_v45 = vrot.slane %v162_v36, 4  ;;  %v170_v47 = vrot.slane %v168_v37, 5 }
  0x29   :  { %v2134_v48 = vrot.slane %v2630_v12, 9  ;;  %v577_v51 = vsel %vm2492_vm2, %v2140_v38, %v576_v0  ;;  %v578_v52 = vrot.slane %v576_v0, 4  ;;  %v534_v55 = vrot.slane %v2638_v17, 5 }
  0x2a   :  { %v156_v49 = vrot.slane %v155_v40, 4  ;;  %1241 = vrot.lane.b32.xlu0 %v2213_v44, %s2432_s16  ;;  %v165_v57 = vor.u32 %v164_v45, %v160_v35  ;;  %v537_v59 = vrot.slane %v2645_v25, 5  ;;  %v761_v60 = vrot.slane %v293_v1, 5 }
  0x2b   :  { %v762_v61 = vrot.slane %v296_v50, 6  ;;  %v580_v63 = vsel %vm2492_vm2, %v578_v52, %v579_v42  ;;  %v535_v3 = vsel %vm2492_vm2, %v2134_v48, %v534_v55  ;;  %v536_v6 = vrot.slane %v534_v55, 4  ;;  %v2746_v42 = vld [vmem:[%s3916_s0 + $0x34] sm:$0xf] }
  0x2c   :  { %v161_v62 = vsel %vm2569_vm8, %v156_v49, %v160_v35  ;;  %v166_v1 = vrot.slane %v165_v57, 4  ;;  %v2204_v50 = vcombine.low %v577_v51, %v580_v63  ;;  %v765_v9 = vrot.slane %v306_v54, 5 }
  0x2d   :  { %v763_v8 = vor.u32 %v762_v61, %v761_v60  ;;  %v538_v10 = vsel %vm2492_vm2, %v536_v6, %v537_v59  ;;  %v766_v11 = vrot.slane %v302_v53, 6  ;;  %v770_v13 = vshrl.u32 %v2607_v46, 16 }
  0x2e   :  { %v773_v14 = vrot.slane %v312_v58, 6  ;;  %v171_v15 = vsel %vm2569_vm8, %v166_v1, %v170_v47  ;;  %1175 = vrot.lane.b32.xlu0 %v2204_v50, %s2431_s15  ;;  %v2198_v16 = vcombine.low %v535_v3, %v538_v10  ;;  %v317_v54 = vshrl.u32 %v2678_v56, 16 }
  0x2f   :  { %v764_v18 = vrot.slane %v763_v8, 4  ;;  %v2182_v19 = vcombine.low %v161_v62, %v171_v15  ;;  %v767_v20 = vor.u32 %v766_v11, %v765_v9  ;;  %v772_v22 = vrot.slane %v770_v13, 5 }
  0x30   :  { %v320_v41 = vshll.u32 %v2678_v56, 16  ;;  %v319_v53 = vrot.slane %v317_v54, 4  ;;  %v326_v46 = vshll.u32 %v2695_v7, 16  ;;  %v330_v58 = vshrl.u32 %v2695_v7, 16 }
  0x31   :  { %v336_v23 = vshll.u32 %v2700_v33, 16  ;;  %1083 = vrot.lane.b32.xlu1 %v2182_v19, %s2433_s19  ;;  %v768_v27 = vsel %vm2553_vm7, %v764_v18, %v767_v20  ;;  %v769_v28 = vrot.slane %v767_v20, 4  ;;  %v774_v29 = vor.u32 %v773_v14, %v772_v22 }
  0x32   :  { %v322_v31 = vrot.slane %v320_v41, 5  ;;  %v328_v32 = vrot.slane %v326_v46, 5  ;;  %v332_v21 = vrot.slane %v330_v58, 4  ;;  %v671_v35 = vrot.slane %v149_v2, 5 }
  0x33   :  { %v338_v34 = vrot.slane %v336_v23, 5  ;;  %v775_v38 = vsel %vm2553_vm7, %v769_v28, %v774_v29  ;;  %v672_v40 = vrot.slane %v152_v26, 6  ;;  %v675_v0 = vrot.slane %v162_v36, 5  ;;  %v2757_v26 = vld [vmem:[%s3916_s0 + $0x38] sm:$0x3] }
  0x34   :  { %v323_v39 = vor.u32 %v322_v31, %v319_v53  ;;  %v2220_v44 = vcombine.low %v768_v27, %v775_v38  ;;  %v333_v45 = vor.u32 %v332_v21, %v328_v32  ;;  %v676_v47 = vrot.slane %v158_v30, 6 }
  0x35   :  { %v680_v2 = vshrl.u32 %v2645_v25, 16  ;;  %1163 = vrot.lane.b32.xlu1 %v2198_v16, %s2431_s15  ;;  %v673_v49 = vor.u32 %v672_v40, %v671_v35  ;;  %v683_v12 = vrot.slane %v168_v37, 6  ;;  %v173_v36 = vshrl.u32 %v2724_v24, 16 }
  0x36   :  { %v324_v48 = vrot.slane %v323_v39, 4  ;;  %1255 = vrot.lane.b32.xlu0 %v2220_v44, %s2432_s16  ;;  %v334_v17 = vrot.slane %v333_v45, 4  ;;  %v677_v30 = vor.u32 %v676_v47, %v675_v0  ;;  %v176_v52 = vshll.u32 %v2724_v24, 16 }
  0x37   :  { %v682_v51 = vrot.slane %v680_v2, 5  ;;  %v674_v57 = vrot.slane %v673_v49, 4  ;;  %v175_v25 = vrot.slane %v173_v36, 4  ;;  %v182_v37 = vshll.u32 %v2746_v42, 16 }
  0x38   :  { %v329_v55 = vsel %vm2569_vm8, %v324_v48, %v328_v32  ;;  %v339_v59 = vsel %vm2569_vm8, %v334_v17, %v338_v34  ;;  %v679_v60 = vrot.slane %v677_v30, 4  ;;  %v178_v62 = vrot.slane %v176_v52, 5 }
  0x39   :  { %v684_v61 = vor.u32 %v683_v12, %v682_v51  ;;  %v2189_v63 = vcombine.low %v329_v55, %v339_v59  ;;  %v678_v3 = vsel %vm2553_vm7, %v674_v57, %v677_v30  ;;  %v184_v6 = vrot.slane %v182_v37, 5 }
  0x3a   :  { %v186_v1 = vshrl.u32 %v2746_v42, 16  ;;  %v179_v8 = vor.u32 %v178_v62, %v175_v25  ;;  %v192_v9 = vshll.u32 %v2757_v26, 16  ;;  %v2141_v10 = vrot.slane %v2678_v56, 9 }
  0x3b   :  { %v685_v50 = vsel %vm2553_vm7, %v679_v60, %v684_v61  ;;  %1097 = vrot.lane.b32.xlu1 %v2189_v63, %s2433_s19  ;;  %v583_v14 = vrot.slane %v2695_v7, 5  ;;  %v586_v15 = vrot.slane %v2700_v33, 5  ;;  %v2135_v19 = vrot.slane %v2724_v24, 9 }
  0x3c   :  { %v2214_v11 = vcombine.low %v678_v3, %v685_v50  ;;  %v188_v13 = vrot.slane %v186_v1, 4  ;;  %v180_v16 = vrot.slane %v179_v8, 4  ;;  %v194_v18 = vrot.slane %v192_v9, 5 }
  0x3d   :  { %v541_v20 = vrot.slane %v2746_v42, 5  ;;  %v584_v53 = vsel %vm2492_vm2, %v2141_v10, %v583_v14  ;;  %v585_v27 = vrot.slane %v583_v14, 4  ;;  %v544_v28 = vrot.slane %v2757_v26, 5 }
  0x3e   :  { %1243 = vrot.lane.b32.xlu0 %v2214_v11, %s2432_s16  ;;  %v189_v22 = vor.u32 %v188_v13, %v184_v6 }
  0x3f   :  { %11 = vsyncpa [#allocation3], 0  ;;  %v185_v29 = vsel %vm2569_vm8, %v180_v16, %v184_v6  ;;  %v542_v31 = vsel %vm2492_vm2, %v2135_v19, %v541_v20  ;;  %v543_v32 = vrot.slane %v541_v20, 4  ;;  %v776_v21 = vrot.slane %v317_v54, 5  ;;  %v2808_v40 = vld [vmem:[%s3916_s0 + $0x84] sm:$0xf] }
  0x40   :  { %v190_v34 = vrot.slane %v189_v22, 4  ;;  %v587_v35 = vsel %vm2492_vm2, %v585_v27, %v586_v15  ;;  %v777_v38 = vrot.slane %v320_v41, 6  ;;  %v780_v39 = vrot.slane %v330_v58, 5  ;;  %v2818_v56 = vld [vmem:[%s3916_s0 + $0x88] sm:$0xf] }
  0x41   :  { %v2205_v0 = vcombine.low %v584_v53, %v587_v35  ;;  %v545_v44 = vsel %vm2492_vm2, %v543_v32, %v544_v28  ;;  %v781_v54 = vrot.slane %v326_v46, 6  ;;  %v785_v45 = vshrl.u32 %v2700_v33, 16  ;;  %v2827_v7 = vld [vmem:[%s3916_s0 + $0x8c] sm:$0x3]  ;;  %v2857_v8 = vld [vmem:[%s3916_s0 + $0x3c] sm:$0xf] }
  0x42   :  { %v195_v41 = vsel %vm2569_vm8, %v190_v34, %v194_v18  ;;  %v2199_v58 = vcombine.low %v542_v31, %v545_v44  ;;  %v778_v47 = vor.u32 %v777_v38, %v776_v21  ;;  %v788_v2 = vrot.slane %v336_v23, 6  ;;  %v2864_v15 = vld [vmem:[%s3916_s0 + $0x40] sm:$0xf]  ;;  %v2878_v42 = vld [vmem:[%s3916_s0 + $0x44] sm:$0x3]  ;;  %v2343_v43 = vld [vmem:[%s3917_s1 + $0x28] sm:$0xff]  }
  0x43   :  { %v2183_v46 = vcombine.low %v185_v29, %v195_v41  ;;  %1177 = vrot.lane.b32.xlu0 %v2205_v0, %s2431_s15  ;;  %v782_v48 = vor.u32 %v781_v54, %v780_v39  ;;  %v787_v49 = vrot.slane %v785_v45, 5  ;;  %v341_v12 = vshrl.u32 %v2808_v40, 16 }
  0x44   :  { %v779_v17 = vrot.slane %v778_v47, 4  ;;  %v344_v30 = vshll.u32 %v2808_v40, 16  ;;  %v350_v51 = vshll.u32 %v2818_v56, 16  ;;  %v354_v33 = vshrl.u32 %v2818_v56, 16 }
  0x45   :  { %1085 = vrot.lane.b32.xlu1 %v2183_v46, %s2433_s19  ;;  %v784_v23 = vrot.slane %v782_v48, 4  ;;  %v789_v55 = vor.u32 %v788_v2, %v787_v49  ;;  %v343_v57 = vrot.slane %v341_v12, 4  ;;  %v360_v25 = vshll.u32 %v2827_v7, 16 }
  0x46   :  { %v783_v59 = vsel %vm2553_vm7, %v779_v17, %v782_v48  ;;  %v346_v60 = vrot.slane %v344_v30, 5  ;;  %v352_v61 = vrot.slane %v350_v51, 5  ;;  %v356_v62 = vrot.slane %v354_v33, 4 }
  0x47   :  { %v790_v63 = vsel %vm2553_vm7, %v784_v23, %v789_v55  ;;  %v362_v3 = vrot.slane %v360_v25, 5  ;;  %v686_v6 = vrot.slane %v173_v36, 5  ;;  %v687_v50 = vrot.slane %v176_v52, 6 }
  0x48   :  { %v2221_v10 = vcombine.low %v783_v59, %v790_v63  ;;  %v347_v11 = vor.u32 %v346_v60, %v343_v57  ;;  %v357_v13 = vor.u32 %v356_v62, %v352_v61  ;;  %v690_v14 = vrot.slane %v186_v1, 5 }
  0x49   :  { %1165 = vrot.lane.b32.xlu1 %v2199_v58, %s2431_s15  ;;  %v688_v24 = vor.u32 %v687_v50, %v686_v6  ;;  %v691_v36 = vrot.slane %v182_v37, 6  ;;  %v695_v52 = vshrl.u32 %v2757_v26, 16  ;;  %v698_v16 = vrot.slane %v192_v9, 6  ;;  %v2922_v6 = vld [vmem:[%s3916_s0 + $0x90] sm:$0xf] }
  0x4a   :  { %1257 = vrot.lane.b32.xlu0 %v2221_v10, %s2432_s16  ;;  %v348_v18 = vrot.slane %v347_v11, 4  ;;  %v358_v1 = vrot.slane %v357_v13, 4  ;;  %v197_v19 = vshrl.u32 %v2857_v8, 16  ;;  %v200_v20 = vshll.u32 %v2857_v8, 16 }
  0x4b   :  { %v689_v22 = vrot.slane %v688_v24, 4  ;;  %v692_v53 = vor.u32 %v691_v36, %v690_v14  ;;  %v697_v27 = vrot.slane %v695_v52, 5  ;;  %v206_v37 = vshll.u32 %v2864_v15, 16  ;;  %v2936_v24 = vld [vmem:[%s3916_s0 + $0x94] sm:$0xf] }
  0x4c   :  { %v353_v26 = vsel %vm2569_vm8, %v348_v18, %v352_v61  ;;  %v363_v9 = vsel %vm2569_vm8, %v358_v1, %v362_v3  ;;  %v199_v28 = vrot.slane %v197_v19, 4  ;;  %v202_v29 = vrot.slane %v200_v20, 5  ;;  %v2944_v36 = vld [vmem:[%s3916_s0 + $0x98] sm:$0x3] }
  0x4d   :  { %v2190_v31 = vcombine.low %v353_v26, %v363_v9  ;;  %v693_v32 = vsel %vm2553_vm7, %v689_v22, %v692_v53  ;;  %v694_v21 = vrot.slane %v692_v53, 4  ;;  %v699_v34 = vor.u32 %v698_v16, %v697_v27 }
  0x4e   :  { %v203_v35 = vor.u32 %v202_v29, %v199_v28  ;;  %v208_v38 = vrot.slane %v206_v37, 5  ;;  %v210_v39 = vshrl.u32 %v2864_v15, 16  ;;  %v216_v0 = vshll.u32 %v2878_v42, 16 }
  0x4f   :  { %1099 = vrot.lane.b32.xlu1 %v2190_v31, %s2433_s19  ;;  %v700_v44 = vsel %vm2553_vm7, %v694_v21, %v699_v34  ;;  %v2142_v54 = vrot.slane %v2808_v40, 9  ;;  %v590_v45 = vrot.slane %v2818_v56, 5  ;;  %v593_v41 = vrot.slane %v2827_v7, 5 }
  0x50   :  { %v2215_v58 = vcombine.low %v693_v32, %v700_v44  ;;  %v204_v47 = vrot.slane %v203_v35, 4  ;;  %v212_v2 = vrot.slane %v210_v39, 4  ;;  %v218_v46 = vrot.slane %v216_v0, 5  ;;  %v2969_v35 = vld [vmem:[%s3916_s0 + $0x48] sm:$0xf] }
  0x51   :  { %v591_v48 = vsel %vm2492_vm2, %v2142_v54, %v590_v45  ;;  %v592_v49 = vrot.slane %v590_v45, 4  ;;  %v2136_v17 = vrot.slane %v2857_v8, 9  ;;  %v548_v23 = vrot.slane %v2864_v15, 5 }
  0x52   :  { %1245 = vrot.lane.b32.xlu0 %v2215_v58, %s2432_s16  ;;  %v209_v55 = vsel %vm2569_vm8, %v204_v47, %v208_v38  ;;  %v213_v57 = vor.u32 %v212_v2, %v208_v38  ;;  %v551_v59 = vrot.slane %v2878_v42, 5  ;;  %v791_v60 = vrot.slane %v341_v12, 5 }
  0x53   :  { %v594_v61 = vsel %vm2492_vm2, %v592_v49, %v593_v41  ;;  %v549_v62 = vsel %vm2492_vm2, %v2136_v17, %v548_v23  ;;  %v550_v63 = vrot.slane %v548_v23, 4  ;;  %v792_v3 = vrot.slane %v344_v30, 6 }
  0x54   :  { %v214_v50 = vrot.slane %v213_v57, 4  ;;  %v2206_v10 = vcombine.low %v591_v48, %v594_v61  ;;  %v795_v12 = vrot.slane %v354_v33, 5  ;;  %v796_v11 = vrot.slane %v350_v51, 6 }
  0x55   :  { %v552_v13 = vsel %vm2492_vm2, %v550_v63, %v551_v59  ;;  %v793_v14 = vor.u32 %v792_v3, %v791_v60  ;;  %v800_v40 = vshrl.u32 %v2827_v7, 16  ;;  %v803_v30 = vrot.slane %v360_v25, 6 }
  0x56   :  { %v219_v33 = vsel %vm2569_vm8, %v214_v50, %v218_v46  ;;  %1179 = vrot.lane.b32.xlu0 %v2206_v10, %s2431_s15  ;;  %v2200_v56 = vcombine.low %v549_v62, %v552_v13  ;;  %v797_v51 = vor.u32 %v796_v11, %v795_v12  ;;  %v365_v7 = vshrl.u32 %v2922_v6, 16 }
  0x57   :  { %v2184_v25 = vcombine.low %v209_v55, %v219_v33  ;;  %v794_v52 = vrot.slane %v793_v14, 4  ;;  %v802_v16 = vrot.slane %v800_v40, 5  ;;  %v368_v18 = vshll.u32 %v2922_v6, 16  ;;  %v2994_v55 = vld [vmem:[%s3916_s0 + $0x50] sm:$0x3] }
  0x58   :  { %v799_v1 = vrot.slane %v797_v51, 4  ;;  %v367_v22 = vrot.slane %v365_v7, 4  ;;  %v374_v53 = vshll.u32 %v2936_v24, 16  ;;  %v378_v27 = vshrl.u32 %v2936_v24, 16 }
  0x59   :  { %1087 = vrot.lane.b32.xlu1 %v2184_v25, %s2433_s19  ;;  %v798_v26 = vsel %vm2553_vm7, %v794_v52, %v797_v51  ;;  %v804_v9 = vor.u32 %v803_v30, %v802_v16  ;;  %v370_v28 = vrot.slane %v368_v18, 5  ;;  %v384_v29 = vshll.u32 %v2944_v36, 16 }
  0x5a   :  { %v376_v31 = vrot.slane %v374_v53, 5  ;;  %v380_v32 = vrot.slane %v378_v27, 4  ;;  %v701_v21 = vrot.slane %v197_v19, 5  ;;  %v702_v34 = vrot.slane %v200_v20, 6  ;;  %v2980_v19 = vld [vmem:[%s3916_s0 + $0x4c] sm:$0xf] }
  0x5b   :  { %v805_v38 = vsel %vm2553_vm7, %v799_v1, %v804_v9  ;;  %v371_v44 = vor.u32 %v370_v28, %v367_v22  ;;  %v386_v54 = vrot.slane %v384_v29, 5  ;;  %v705_v45 = vrot.slane %v210_v39, 5 }
  0x5c   :  { %v2222_v41 = vcombine.low %v798_v26, %v805_v38  ;;  %v381_v58 = vor.u32 %v380_v32, %v376_v31  ;;  %v703_v47 = vor.u32 %v702_v34, %v701_v21  ;;  %v706_v8 = vrot.slane %v206_v37, 6  ;;  %v3034_v21 = vld [vmem:[%s3916_s0 + $0x9c] sm:$0xf] }
  0x5d   :  { %1167 = vrot.lane.b32.xlu1 %v2200_v56, %s2431_s15  ;;  %v372_v20 = vrot.slane %v371_v44, 4  ;;  %v710_v2 = vshrl.u32 %v2878_v42, 16  ;;  %v713_v46 = vrot.slane %v216_v0, 6  ;;  %v221_v39 = vshrl.u32 %v2969_v35, 16 }
  0x5e   :  { %1259 = vrot.lane.b32.xlu0 %v2222_v41, %s2432_s16  ;;  %v382_v48 = vrot.slane %v381_v58, 4  ;;  %v704_v15 = vrot.slane %v703_v47, 4  ;;  %v707_v37 = vor.u32 %v706_v8, %v705_v45  ;;  %v224_v49 = vshll.u32 %v2969_v35, 16 }
  0x5f   :  { %v377_v17 = vsel %vm2569_vm8, %v372_v20, %v376_v31  ;;  %v712_v23 = vrot.slane %v710_v2, 5  ;;  %v223_v42 = vrot.slane %v221_v39, 4  ;;  %v230_v0 = vshll.u32 %v2980_v19, 16 }
  0x60   :  { %v387_v57 = vsel %vm2569_vm8, %v382_v48, %v386_v54  ;;  %v708_v59 = vsel %vm2553_vm7, %v704_v15, %v707_v37  ;;  %v709_v60 = vrot.slane %v707_v37, 4  ;;  %v226_v61 = vrot.slane %v224_v49, 5 }
  0x61   :  { %v2191_v62 = vcombine.low %v377_v17, %v387_v57  ;;  %v714_v63 = vor.u32 %v713_v46, %v712_v23  ;;  %v232_v3 = vrot.slane %v230_v0, 5  ;;  %v234_v50 = vshrl.u32 %v2980_v19, 16 }
  0x62   :  { %v227_v10 = vor.u32 %v226_v61, %v223_v42  ;;  %v240_v12 = vshll.u32 %v2994_v55, 16  ;;  %v2143_v11 = vrot.slane %v2922_v6, 9  ;;  %v597_v13 = vrot.slane %v2936_v24, 5 }
  0x63   :  { %1101 = vrot.lane.b32.xlu1 %v2191_v62, %s2433_s19  ;;  %v715_v14 = vsel %vm2553_vm7, %v709_v60, %v714_v63  ;;  %v236_v40 = vrot.slane %v234_v50, 4  ;;  %v600_v30 = vrot.slane %v2944_v36, 5  ;;  %v2137_v33 = vrot.slane %v2969_v35, 9  ;;  %v3095_v35 = vld [vmem:[%s3916_s0 + $0x58] sm:$0xf] }
  0x64   :  { %v2216_v56 = vcombine.low %v708_v59, %v715_v14  ;;  %v228_v51 = vrot.slane %v227_v10, 4  ;;  %v242_v25 = vrot.slane %v240_v12, 5  ;;  %v598_v52 = vsel %vm2492_vm2, %v2143_v11, %v597_v13 }
  0x65   :  { %v237_v16 = vor.u32 %v236_v40, %v232_v3  ;;  %v599_v1 = vrot.slane %v597_v13, 4  ;;  %v555_v22 = vrot.slane %v2980_v19, 5  ;;  %v558_v26 = vrot.slane %v2994_v55, 5  ;;  %v3085_v13 = vld [vmem:[%s3916_s0 + $0x54] sm:$0xf] }
  0x66   :  { %1247 = vrot.lane.b32.xlu0 %v2216_v56, %s2432_s16  ;;  %v233_v9 = vsel %vm2569_vm8, %v228_v51, %v232_v3  ;;  %v806_v28 = vrot.slane %v365_v7, 5  ;;  %v807_v31 = vrot.slane %v368_v18, 6  ;;  %v810_v32 = vrot.slane %v378_v27, 5  ;;  %v3046_v27 = vld [vmem:[%s3916_s0 + $0xa0] sm:$0xf] }
  0x67   :  { %v238_v34 = vrot.slane %v237_v16, 4  ;;  %v601_v38 = vsel %vm2492_vm2, %v599_v1, %v600_v30  ;;  %v556_v44 = vsel %vm2492_vm2, %v2137_v33, %v555_v22  ;;  %v557_v54 = vrot.slane %v555_v22, 4  ;;  %v3105_v1 = vld [vmem:[%s3916_s0 + $0x5c] sm:$0x3] }
  0x68   :  { %v2207_v7 = vcombine.low %v598_v52, %v601_v38  ;;  %v808_v45 = vor.u32 %v807_v31, %v806_v28  ;;  %v811_v6 = vrot.slane %v374_v53, 6  ;;  %v815_v18 = vshrl.u32 %v2944_v36, 16  ;;  %v3057_v53 = vld [vmem:[%s3916_s0 + $0xa4] sm:$0x3] }
  0x69   :  { %v243_v41 = vsel %vm2569_vm8, %v238_v34, %v242_v25  ;;  %v559_v58 = vsel %vm2492_vm2, %v557_v54, %v558_v26  ;;  %v818_v47 = vrot.slane %v384_v29, 6  ;;  %v389_v8 = vshrl.u32 %v3034_v21, 16 }
  0x6a   :  { %v2185_v20 = vcombine.low %v233_v9, %v243_v41  ;;  %1181 = vrot.lane.b32.xlu0 %v2207_v7, %s2431_s15  ;;  %v2201_v2 = vcombine.low %v556_v44, %v559_v58  ;;  %v809_v46 = vrot.slane %v808_v45, 4  ;;  %v812_v48 = vor.u32 %v811_v6, %v810_v32 }
  0x6b   :  { %v817_v15 = vrot.slane %v815_v18, 5  ;;  %v391_v37 = vrot.slane %v389_v8, 4  ;;  %v392_v36 = vshll.u32 %v3034_v21, 16  ;;  %v398_v29 = vshll.u32 %v3046_v27, 16 }
  0x6c   :  { %1089 = vrot.lane.b32.xlu1 %v2185_v20, %s2433_s19  ;;  %v813_v17 = vsel %vm2553_vm7, %v809_v46, %v812_v48  ;;  %v814_v23 = vrot.slane %v812_v48, 4  ;;  %v402_v42 = vshrl.u32 %v3046_v27, 16  ;;  %v408_v57 = vshll.u32 %v3057_v53, 16 }
  0x6d   :  { %v819_v59 = vor.u32 %v818_v47, %v817_v15  ;;  %v394_v60 = vrot.slane %v392_v36, 5  ;;  %v400_v61 = vrot.slane %v398_v29, 5  ;;  %v716_v62 = vrot.slane %v221_v39, 5 }
  0x6e   :  { %v404_v63 = vrot.slane %v402_v42, 4  ;;  %v410_v3 = vrot.slane %v408_v57, 5  ;;  %v717_v10 = vrot.slane %v224_v49, 6  ;;  %v720_v11 = vrot.slane %v234_v50, 5 }
  0x6f   :  { %v820_v14 = vsel %vm2553_vm7, %v814_v23, %v819_v59  ;;  %v395_v40 = vor.u32 %v394_v60, %v391_v37  ;;  %v721_v39 = vrot.slane %v230_v0, 6  ;;  %v725_v30 = vshrl.u32 %v2994_v55, 16 }
  0x70   :  { %1169 = vrot.lane.b32.xlu1 %v2201_v2, %s2431_s15  ;;  %v2223_v49 = vcombine.low %v813_v17, %v820_v14  ;;  %v405_v50 = vor.u32 %v404_v63, %v400_v61  ;;  %v718_v33 = vor.u32 %v717_v10, %v716_v62  ;;  %v728_v56 = vrot.slane %v240_v12, 6 }
  0x71   :  { %v396_v51 = vrot.slane %v395_v40, 4  ;;  %v722_v25 = vor.u32 %v721_v39, %v720_v11  ;;  %v727_v52 = vrot.slane %v725_v30, 5  ;;  %v245_v19 = vshrl.u32 %v3085_v13, 16  ;;  %v3150_v11 = vld [vmem:[%s3916_s0 + $0xa8] sm:$0xf] }
  0x72   :  { %1261 = vrot.lane.b32.xlu0 %v2223_v49, %s2432_s16  ;;  %v406_v0 = vrot.slane %v405_v50, 4  ;;  %v719_v16 = vrot.slane %v718_v33, 4  ;;  %v248_v22 = vshll.u32 %v3085_v13, 16  ;;  %v254_v26 = vshll.u32 %v3095_v35, 16  ;;  %v3157_v39 = vld [vmem:[%s3916_s0 + $0xac] sm:$0xf] }
  0x73   :  { %v401_v55 = vsel %vm2569_vm8, %v396_v51, %v400_v61  ;;  %v724_v12 = vrot.slane %v722_v25, 4  ;;  %v729_v9 = vor.u32 %v728_v56, %v727_v52  ;;  %v247_v28 = vrot.slane %v245_v19, 4 }
  0x74   :  { %v411_v31 = vsel %vm2569_vm8, %v406_v0, %v410_v3  ;;  %v723_v32 = vsel %vm2553_vm7, %v719_v16, %v722_v25  ;;  %v250_v34 = vrot.slane %v248_v22, 5  ;;  %v256_v38 = vrot.slane %v254_v26, 5 }
  0x75   :  { %v2192_v44 = vcombine.low %v401_v55, %v411_v31  ;;  %v730_v54 = vsel %vm2553_vm7, %v724_v12, %v729_v9  ;;  %v258_v7 = vshrl.u32 %v3095_v35, 16  ;;  %v264_v45 = vshll.u32 %v3105_v1, 16 }
  0x76   :  { %v2217_v6 = vcombine.low %v723_v32, %v730_v54  ;;  %v251_v18 = vor.u32 %v250_v34, %v247_v28  ;;  %v2144_v41 = vrot.slane %v3034_v21, 9  ;;  %v604_v58 = vrot.slane %v3046_v27, 5 }
  0x77   :  { %1103 = vrot.lane.b32.xlu1 %v2192_v44, %s2433_s19  ;;  %v260_v47 = vrot.slane %v258_v7, 4  ;;  %v266_v20 = vrot.slane %v264_v45, 5  ;;  %v607_v2 = vrot.slane %v3057_v53, 5  ;;  %v2138_v46 = vrot.slane %v3085_v13, 9 }
  0x78   :  { %1249 = vrot.lane.b32.xlu0 %v2217_v6, %s2432_s16  ;;  %v252_v48 = vrot.slane %v251_v18, 4  ;;  %v605_v15 = vsel %vm2492_vm2, %v2144_v41, %v604_v58  ;;  %v606_v37 = vrot.slane %v604_v58, 4  ;;  %v562_v17 = vrot.slane %v3095_v35, 5  ;;  %v3197_v41 = vld [vmem:[%s3916_s0 + $0x60] sm:$0xf] }
  0x79   :  { %v261_v23 = vor.u32 %v260_v47, %v256_v38  ;;  %v565_v59 = vrot.slane %v3105_v1, 5  ;;  %v821_v60 = vrot.slane %v389_v8, 5  ;;  %v822_v61 = vrot.slane %v392_v36, 6 }
  0x7a   :  { %v257_v62 = vsel %vm2569_vm8, %v252_v48, %v256_v38  ;;  %v608_v63 = vsel %vm2492_vm2, %v606_v37, %v607_v2  ;;  %v563_v3 = vsel %vm2492_vm2, %v2138_v46, %v562_v17  ;;  %v564_v10 = vrot.slane %v562_v17, 4  ;;  %v3209_v37 = vld [vmem:[%s3916_s0 + $0x64] sm:$0xf] }
  0x7b   :  { %v262_v14 = vrot.slane %v261_v23, 4  ;;  %v2208_v8 = vcombine.low %v605_v15, %v608_v63  ;;  %v823_v40 = vor.u32 %v822_v61, %v821_v60  ;;  %v825_v36 = vrot.slane %v402_v42, 5  ;;  %v3169_v42 = vld [vmem:[%s3916_s0 + $0xb0] sm:$0x3] }
  0x7c   :  { %v566_v30 = vsel %vm2492_vm2, %v564_v10, %v565_v59  ;;  %v826_v49 = vrot.slane %v398_v29, 6  ;;  %v830_v50 = vshrl.u32 %v3057_v53, 16  ;;  %v833_v33 = vrot.slane %v408_v57, 6 }
  0x7d   :  { %v267_v56 = vsel %vm2569_vm8, %v262_v14, %v266_v20  ;;  %1183 = vrot.lane.b32.xlu0 %v2208_v8, %s2431_s15  ;;  %v2202_v51 = vcombine.low %v563_v3, %v566_v30  ;;  %v824_v25 = vrot.slane %v823_v40, 4  ;;  %v413_v52 = vshrl.u32 %v3150_v11, 16  ;;  %v3222_v3 = vld [vmem:[%s3916_s0 + $0x68] sm:$0x3] }
  0x7e   :  { %v2186_v29 = vcombine.low %v257_v62, %v267_v56  ;;  %v827_v0 = vor.u32 %v826_v49, %v825_v36  ;;  %v832_v16 = vrot.slane %v830_v50, 5  ;;  %v416_v55 = vshll.u32 %v3150_v11, 16  ;;  %v3232_v56 = vpop.permute.xlu0 %1157 }
  0x7f   :  { %v415_v57 = vrot.slane %v413_v52, 4  ;;  %v422_v12 = vshll.u32 %v3157_v39, 16  ;;  %v426_v9 = vshrl.u32 %v3157_v39, 16  ;;  %v432_v28 = vshll.u32 %v3169_v42, 16 }
  0x80   :  { %1091 = vrot.lane.b32.xlu1 %v2186_v29, %s2433_s19  ;;  %v828_v31 = vsel %vm2553_vm7, %v824_v25, %v827_v0  ;;  %v829_v32 = vrot.slane %v827_v0, 4  ;;  %v834_v34 = vor.u32 %v833_v33, %v832_v16  ;;  %v418_v38 = vrot.slane %v416_v55, 5 }
  0x81   :  { %v424_v44 = vrot.slane %v422_v12, 5  ;;  %v428_v54 = vrot.slane %v426_v9, 4  ;;  %v434_v6 = vrot.slane %v432_v28, 5  ;;  %v731_v18 = vrot.slane %v245_v19, 5 }
  0x82   :  { %v835_v58 = vsel %vm2553_vm7, %v829_v32, %v834_v34  ;;  %v419_v47 = vor.u32 %v418_v38, %v415_v57  ;;  %v732_v20 = vrot.slane %v248_v22, 6  ;;  %v735_v2 = vrot.slane %v258_v7, 5 }
  0x83   :  { %v2224_v46 = vcombine.low %v828_v31, %v835_v58  ;;  %v429_v48 = vor.u32 %v428_v54, %v424_v44  ;;  %v736_v15 = vrot.slane %v254_v26, 6  ;;  %v740_v19 = vshrl.u32 %v3105_v1, 16 }
  0x84   :  { %1171 = vrot.lane.b32.xlu1 %v2202_v51, %s2431_s15  ;;  %v420_v17 = vrot.slane %v419_v47, 4  ;;  %v733_v23 = vor.u32 %v732_v20, %v731_v18  ;;  %v743_v22 = vrot.slane %v264_v45, 6  ;;  %v269_v7 = vshrl.u32 %v3197_v41, 16 }
  0x85   :  { %1263 = vrot.lane.b32.xlu0 %v2224_v46, %s2432_s16  ;;  %v430_v59 = vrot.slane %v429_v48, 4  ;;  %v737_v26 = vor.u32 %v736_v15, %v735_v2  ;;  %v742_v60 = vrot.slane %v740_v19, 5  ;;  %v272_v61 = vshll.u32 %v3197_v41, 16  ;;  %v3253_v15 = vpop.permute.xlu1 %1161 }
  0x86   :  { %v425_v62 = vsel %vm2569_vm8, %v420_v17, %v424_v44  ;;  %v734_v63 = vrot.slane %v733_v23, 4  ;;  %v271_v45 = vrot.slane %v269_v7, 4  ;;  %v278_v10 = vshll.u32 %v3209_v37, 16 }
  0x87   :  { %v435_v14 = vsel %vm2569_vm8, %v430_v59, %v434_v6  ;;  %v739_v8 = vrot.slane %v737_v26, 4  ;;  %v744_v40 = vor.u32 %v743_v22, %v742_v60  ;;  %v274_v36 = vrot.slane %v272_v61, 5  ;;  %v3261_v59 = vpop.permute.xlu0 %1159 }
  0x88   :  { %v2193_v30 = vcombine.low %v425_v62, %v435_v14  ;;  %v738_v49 = vsel %vm2553_vm7, %v734_v63, %v737_v26  ;;  %v280_v50 = vrot.slane %v278_v10, 5  ;;  %v282_v33 = vshrl.u32 %v3209_v37, 16  ;;  %v2338_v63 = vld [vmem:[%s3917_s1] sm:$0xff]  }
  0x89   :  { %v745_v51 = vsel %vm2553_vm7, %v739_v8, %v744_v40  ;;  %v275_v25 = vor.u32 %v274_v36, %v271_v45  ;;  %v288_v29 = vshll.u32 %v3222_v3, 16  ;;  %v2145_v0 = vrot.slane %v3150_v11, 9 }
  0x8a   :  { %1105 = vrot.lane.b32.xlu1 %v2193_v30, %s2433_s19  ;;  %v2218_v16 = vcombine.low %v738_v49, %v745_v51  ;;  %v284_v57 = vrot.slane %v282_v33, 4  ;;  %v611_v31 = vrot.slane %v3157_v39, 5  ;;  %v614_v32 = vrot.slane %v3169_v42, 5 }
  0x8b   :  { %v276_v34 = vrot.slane %v275_v25, 4  ;;  %v290_v38 = vrot.slane %v288_v29, 5  ;;  %v2139_v44 = vrot.slane %v3197_v41, 9  ;;  %v569_v54 = vrot.slane %v3209_v37, 5 }
  0x8c   :  { %1251 = vrot.lane.b32.xlu0 %v2218_v16, %s2432_s16  ;;  %v285_v6 = vor.u32 %v284_v57, %v280_v50  ;;  %v612_v18 = vsel %vm2492_vm2, %v2145_v0, %v611_v31  ;;  %v613_v58 = vrot.slane %v611_v31, 4  ;;  %v572_v47 = vrot.slane %v3222_v3, 5  ;;  %v3290_v31 = vld [vmem:[%s3916_s0 + $0xb8] sm:$0xf] }
  0x8d   :  { %v281_v20 = vsel %vm2569_vm8, %v276_v34, %v280_v50  ;;  %v570_v2 = vsel %vm2492_vm2, %v2139_v44, %v569_v54  ;;  %v571_v46 = vrot.slane %v569_v54, 4  ;;  %v836_v48 = vrot.slane %v413_v52, 5 }
  0x8e   :  { %v286_v19 = vrot.slane %v285_v6, 4  ;;  %v615_v17 = vsel %vm2492_vm2, %v613_v58, %v614_v32  ;;  %v837_v23 = vrot.slane %v416_v55, 6  ;;  %v840_v22 = vrot.slane %v426_v9, 5 }
  0x8f   :  { %v2209_v26 = vcombine.low %v612_v18, %v615_v17  ;;  %v573_v60 = vsel %vm2492_vm2, %v571_v46, %v572_v47  ;;  %v841_v52 = vrot.slane %v422_v12, 6  ;;  %v845_v62 = vshrl.u32 %v3169_v42, 16  ;;  %v3279_v12 = vld [vmem:[%s3916_s0 + $0xb4] sm:$0xf]  ;;  %v3308_v18 = vld [vmem:[%s3916_s0 + $0xbc] sm:$0x3] }
  0x90   :  { %v291_v55 = vsel %vm2569_vm8, %v286_v19, %v290_v38  ;;  %v2203_v45 = vcombine.low %v570_v2, %v573_v60  ;;  %v838_v9 = vor.u32 %v837_v23, %v836_v48  ;;  %v848_v14 = vrot.slane %v432_v28, 6  ;;  %v3301_v38 = vpop.permute.xlu0 %1077  ;;  %v2340_v23 = vld [vmem:[%s3917_s1 + $0x10] sm:$0xff]  }
  0x91   :  { %v2187_v8 = vcombine.low %v281_v20, %v291_v55  ;;  %1185 = vrot.lane.b32.xlu0 %v2209_v26, %s2431_s15  ;;  %v842_v40 = vor.u32 %v841_v52, %v840_v22  ;;  %v847_v36 = vrot.slane %v845_v62, 5  ;;  %v2434_v49 = vmov 0  }
  0x92   :  { %v839_v30 = vrot.slane %v838_v9, 4  ;;  %1583 = vmatprep.subr.bf16.mxu0 %v2434_v49  ;;  %v746_v50 = vrot.slane %v269_v7, 5  ;;  %v747_v51 = vrot.slane %v272_v61, 6  ;;  %v750_v25 = vrot.slane %v282_v33, 5  ;;  %2309 = vmatprep.subr.bf16.mxu1 %v2434_v49  ;;  %v2339_v7 = vld [vmem:[%s3917_s1 + $0x8] sm:$0xff]   ;;  %v3295_v61 = vpop.permute.xlu1 %1237 }
  0x93   :  { %1093 = vrot.lane.b32.xlu1 %v2187_v8, %s2433_s19  ;;  %v844_v28 = vrot.slane %v842_v40, 4  ;;  %v849_v0 = vor.u32 %v848_v14, %v847_v36  ;;  %1584 = vmatpush1.bf16.msra.mxu0 %v2338_v63  ;;  %v751_v16 = vrot.slane %v278_v10, 6  ;;  %v755_v57 = vshrl.u32 %v3222_v3, 16 }
  0x94   :  { %v843_v33 = vsel %vm2553_vm7, %v839_v30, %v842_v40  ;;  %v748_v32 = vor.u32 %v747_v51, %v746_v50  ;;  %v758_v34 = vrot.slane %v288_v29, 6  ;;  %v437_v10 = vshrl.u32 %v3279_v12, 16  ;;  %1585 = vmatprep.subr.bf16.mxu0 %v2434_v49  ;;  %2319 = vmatpush1.bf16.msra.mxu1 %v2338_v63 }
  0x95   :  { %v850_v44 = vsel %vm2553_vm7, %v844_v28, %v849_v0  ;;  %v752_v54 = vor.u32 %v751_v16, %v750_v25  ;;  %v757_v6 = vrot.slane %v755_v57, 5  ;;  %v440_v58 = vshll.u32 %v3279_v12, 16  ;;  %2310 = vmatprep.subr.bf16.mxu1 %v2434_v49  ;;  %v2341_v0 = vld [vmem:[%s3917_s1 + $0x18] sm:$0xff]  }
  0x96   :  { %v2225_v29 = vcombine.low %v843_v33, %v850_v44  ;;  %v749_v47 = vrot.slane %v748_v32, 4  ;;  %v439_v20 = vrot.slane %v437_v10, 4  ;;  %v446_v2 = vshll.u32 %v3290_v31, 16  ;;  %v3327_v9 = vpop.permute.xlu1 %1079  ;;  %v3331_v30 = vpop.permute.xlu0 %1081 }
  0x97   :  { %1173 = vrot.lane.b32.xlu1 %v2203_v45, %s2431_s15  ;;  %v754_v46 = vrot.slane %v752_v54, 4  ;;  %v759_v48 = vor.u32 %v758_v34, %v757_v6  ;;  %v442_v19 = vrot.slane %v440_v58, 5  ;;  %v450_v17 = vshrl.u32 %v3290_v31, 16  ;;  %1586 = vmatpush1.bf16.msra.mxu0 %v2339_v7 }
  0x98   :  { %1265 = vrot.lane.b32.xlu0 %v2225_v29, %s2432_s16  ;;  %v753_v22 = vsel %vm2553_vm7, %v749_v47, %v752_v54  ;;  %v448_v26 = vrot.slane %v446_v2, 5  ;;  %v456_v60 = vshll.u32 %v3308_v18, 16  ;;  %v2146_v52 = vrot.slane %v3279_v12, 9  ;;  %1587 = vmatprep.subr.bf16.mxu0 %v2434_v49 }
  0x99   :  { %v760_v62 = vsel %vm2553_vm7, %v754_v46, %v759_v48  ;;  %v443_v63 = vor.u32 %v442_v19, %v439_v20  ;;  %v452_v55 = vrot.slane %v450_v17, 4  ;;  %v618_v45 = vrot.slane %v3290_v31, 5  ;;  %2320 = vmatpush1.bf16.msra.mxu1 %v2339_v7  ;;  %v2342_v20 = vld [vmem:[%s3917_s1 + $0x20] sm:$0xff]  }
  0x9a   :  { %v2219_v14 = vcombine.low %v753_v22, %v760_v62  ;;  %v458_v8 = vrot.slane %v456_v60, 5  ;;  %v621_v40 = vrot.slane %v3308_v18, 5  ;;  %v851_v36 = vrot.slane %v437_v10, 5  ;;  %2311 = vmatprep.subr.bf16.mxu1 %v2434_v49 }
  0x9b   :  { %v444_v50 = vrot.slane %v443_v63, 4  ;;  %v453_v51 = vor.u32 %v452_v55, %v448_v26  ;;  %v619_v25 = vsel %vm2492_vm2, %v2146_v52, %v618_v45  ;;  %v620_v28 = vrot.slane %v618_v45, 4  ;;  %1588 = vmatpush1.bf16.msra.mxu0 %v2340_v23  ;;  %v2373_v52 = vld [vmem:[%s3916_s0 + $0x4] sm:$0xf]  ;;  %v2374_v55 = vld [vmem:[%s3916_s0 + $0x8] sm:$0x3] }
  0x9c   :  { %1253 = vrot.lane.b32.xlu0 %v2219_v14, %s2432_s16  ;;  %v852_v16 = vrot.slane %v440_v58, 6  ;;  %v855_v57 = vrot.slane %v450_v17, 5  ;;  %v856_v7 = vrot.slane %v446_v2, 6  ;;  %v860_v33 = vshrl.u32 %v3308_v18, 16  ;;  %1589 = vmatprep.subr.bf16.mxu0 %v2434_v49  ;;  %v3351_v2 = vpop.permute.xlu1 %1239  ;;  %v3355_v17 = vpop.permute.xlu0 %1241 }
  0x9d   :  { %v449_v32 = vsel %vm2569_vm8, %v444_v50, %v448_v26  ;;  %v454_v34 = vrot.slane %v453_v51, 4  ;;  %v622_v10 = vsel %vm2492_vm2, %v620_v28, %v621_v40  ;;  %v863_v44 = vrot.slane %v456_v60, 6  ;;  %2321 = vmatpush1.bf16.msra.mxu1 %v2340_v23  ;;  %v2372_v26 = vld [vmem:[%s3916_s0] sm:$0xf]  ;;  %v2344_v51 = vld [vmem:[%s3917_s1 + $0x30] sm:$0xff]  }
  0x9e   :  { %v2210_v54 = vcombine.low %v619_v25, %v622_v10  ;;  %v853_v6 = vor.u32 %v852_v16, %v851_v36  ;;  %v857_v29 = vor.u32 %v856_v7, %v855_v57  ;;  %v862_v47 = vrot.slane %v860_v33, 5  ;;  %2312 = vmatprep.subr.bf16.mxu1 %v2434_v49  ;;  %v2375_v28 = vld [vmem:[%s3916_s0 + $0x6c] sm:$0xf]  ;;  %v2376_v16 = vld [vmem:[%s3916_s0 + $0x70] sm:$0xf] }
  0x9f   :  { %v459_v58 = vsel %vm2569_vm8, %v454_v34, %v458_v8  ;;  %1590 = vmatpush1.bf16.msra.mxu0 %v2341_v0  ;;  %vm866_vm9 = vcmask 1041408   ;;  %vm867_vm10 = vcmask 1045508   ;;  %v2147_v60 = vrot.slane %v2372_v26, 10  ;;  %v2377_v7 = vld [vmem:[%s3916_s0 + $0x74] sm:$0x3] }
  0xa0   :  { %v2194_v5 = vcombine.low %v449_v32, %v459_v58  ;;  %1187 = vrot.lane.b32.xlu0 %v2210_v54, %s2431_s15  ;;  %v854_v46 = vrot.slane %v853_v6, 4  ;;  %v859_v48 = vrot.slane %v857_v29, 4  ;;  %v864_v19 = vor.u32 %v863_v44, %v862_v47  ;;  %1591 = vmatprep.subr.bf16.mxu0 %v2434_v49  ;;  %vm3363_vm11 = vmor %vm866_vm9, %vm867_vm10  ;;  %v3382_v40 = vpop.permute.xlu1 %1095  ;;  %v3388_v50 = vpop.permute.xlu0 %1175  ;;  %v2345_v32 = vld [vmem:[%s3917_s1 + $0x38] sm:$0xff]   ;;  %v3416_v54 = vld [vmem:[%s3916_s0 + $0x10] sm:$0xf] }
  0xa1   :  { %2322 = vmatpush1.bf16.msra.mxu1 %v2341_v0  ;;  %v871_v62 = vrot.slane %v2373_v52, 6  ;;  %v874_v45 = vrot.slane %v2374_v55, 6  ;;  %vm1317_vm12 = vcmask 261120   ;;  %v2156_v0 = vrot.slane %v2375_v28, 10  ;;  %v2382_v55 = vld [vmem:[%s3916_s0 + $0x78] sm:$0xf] }
  0xa2   :  { %1107 = vrot.lane.b32.xlu1 %v2194_v5, %s2433_s19  ;;  %v858_v4 = vsel %vm2553_vm7, %v854_v46, %v857_v29  ;;  %v865_v23 = vsel %vm2553_vm7, %v859_v48, %v864_v19  ;;  %2313 = vmatprep.subr.bf16.mxu1 %v2434_v49  ;;  %v934_v57 = vrot.slane %v2376_v16, 6  ;;  %v937_v33 = vrot.slane %v2377_v7, 6  ;;  %v2346_v5 = vld [vmem:[%s3917_s1 + $0x40] sm:$0xff]   ;;  %v3428_v46 = vld [vmem:[%s3916_s0 + $0x7c] sm:$0xf] }
  0xa3   :  { %v2226_v63 = vcombine.low %v858_v4, %v865_v23  ;;  %1592 = vmatpush1.bf16.msra.mxu0 %v2342_v20  ;;  %v872_v14 = vsel %vm3363_vm11, %v2147_v60, %v871_v62  ;;  %v873_v8 = vrot.slane %v871_v62, 4  ;;  %v878_v6 = vrot.slane %v3416_v54, 6  ;;  %v2380_v19 = vld [vmem:[%s3916_s0 + $0xc] sm:$0xf] }
  0xa4   :  { %1593 = vmatprep.subr.bf16.mxu0 %v2434_v49  ;;  %v3408_v34 = vpop.permute.xlu1 %1083  ;;  %v935_v10 = vsel %vm3363_vm11, %v2156_v0, %v934_v57  ;;  %v936_v44 = vrot.slane %v934_v57, 4  ;;  %v2163_v47 = vcombine.low %v2372_v26, %v2373_v52  ;;  %v941_v48 = vrot.slane %v3428_v46, 6  ;;  %v2381_v26 = vld [vmem:[%s3916_s0 + $0x14] sm:$0x3]  ;;  %v2384_v0 = vld [vmem:[%s3916_s0 + $0x1c] sm:$0xf] }
  0xa5   :  { %2323 = vmatpush1.bf16.msra.mxu1 %v2342_v20  ;;  %v875_v36 = vsel %vm3363_vm11, %v873_v8, %v874_v45  ;;  %v2148_v4 = vrot.slane %v2380_v19, 10  ;;  %v880_v23 = vrot.slane %v878_v6, 4  ;;  %v881_v60 = vrot.slane %v2381_v26, 6  ;;  %v2383_v8 = vld [vmem:[%s3916_s0 + $0x80] sm:$0x3] }
  0xa6   :  { %1267 = vrot.lane.b32.xlu1 %v2226_v63, %s2432_s16  ;;  %2314 = vmatprep.subr.bf16.mxu1 %v2434_v49  ;;  %v2227_v25 = vcombine.low %v872_v14, %v875_v36  ;;  %v938_v58 = vsel %vm3363_vm11, %v936_v44, %v937_v33  ;;  %v1320_v52 = vsel %vm1317_vm12, %v2163_v47, %v3301_v38  ;;  %vm1366_vm13 = vcmask 523264   ;;  %v2349_v36 = vld [vmem:[%s3917_s1 + $0x48] sm:$0xff]   ;;  %v2386_v47 = vld [vmem:[%s3916_s0 + $0x18] sm:$0xf] }
  0xa7   :  { %1594 = vmatpush1.bf16.msra.mxu0 %v2343_v43  ;;  %v2236_v20 = vcombine.low %v935_v10, %v938_v58  ;;  %v2172_v62 = vcombine.low %v2375_v28, %v2376_v16  ;;  %v2157_v45 = vrot.slane %v2382_v55, 10  ;;  %v943_v14 = vrot.slane %v941_v48, 4  ;;  %v3475_v33 = vld [vmem:[%s3916_s0 + $0x88] sm:$0xf] }
  0xa8   :  { %1595 = vmatprep.subr.bf16.mxu0 %v2434_v49  ;;  %2254 = vmatprep.mubr.msk.bf16.mxu0 %vm1317_vm12, %v2227_v25  ;;  %v1256_v29 = vpop.permute.xlu0 %1255  ;;  %v3441_v63 = vpop.permute.xlu1 %1163  ;;  %v944_v38 = vrot.slane %v2383_v8, 6  ;;  %vm1399_vm14 = vcmask 785408   ;;  %v879_v25 = vsel %vm3363_vm11, %v2148_v4, %v878_v6  ;;  %v882_v28 = vsel %vm3363_vm11, %v880_v23, %v881_v60  ;;  %v2389_v60 = vld [vmem:[%s3916_s0 + $0x8c] sm:$0x3] }
  0xa9   :  { %2324 = vmatpush1.bf16.msra.mxu1 %v2343_v43  ;;  %2263 = vmatprep.mubr.msk.bf16.mxu1 %vm1317_vm12, %v2236_v20  ;;  %v885_v16 = vrot.slane %v2384_v0, 6  ;;  %v1347_v57 = vsel %vm1317_vm12, %v2172_v62, %v3382_v40  ;;  %v2164_v10 = vcombine.low %v2380_v19, %v3416_v54  ;;  %v2149_v58 = vrot.slane %v2386_v47, 10 }
  0xaa   :  { %2315 = vmatprep.subr.bf16.mxu1 %v2434_v49  ;;  %v945_v7 = vsel %vm3363_vm11, %v943_v14, %v944_v38  ;;  %v1386_v6 = vsel %vm1366_vm13, %v1347_v57, %v3388_v50  ;;  %v2173_v19 = vcombine.low %v2382_v55, %v3428_v46  ;;  %v3494_v50 = vld [vmem:[%s3916_s0 + $0x84] sm:$0xf]  ;;  %v3510_v55 = vld [vmem:[%s3916_s0 + $0x28] sm:$0xf]  ;;  %vm2436_vm15 = vmmov 0  }
  0xab   :  { %1596 = vmatpush1.bf16.msra.mxu0 %v2344_v51  ;;  %v887_v20 = vrot.slane %v885_v16, 4  ;;  %v2158_v23 = vrot.slane %v3494_v50, 10  ;;  %v886_v46 = vsel %vm3363_vm11, %v2149_v58, %v885_v16  ;;  %v2391_v38 = vld [vmem:[%s3916_s0 + $0x24] sm:$0xf]  ;;  %v2178_v58 = vcombine.low %v3279_v12, %v3290_v31 }
  0xac   :  { %1597 = vmatprep.subr.bf16.mxu0 %v2434_v49  ;;  %vm2001_vm2 = vcmask 1041409   ;;  %vm2003_vm3 = vcmask 1042434   ;;  %vm2005_vm4 = vcmask 1043459   ;;  %vm2007_vm5 = vcmask 1044484  }
  0xad   :  { %2325 = vmatpush1.bf16.msra.mxu1 %v2344_v51  ;;  %v1368_v51 = vsel %vm1366_vm13, %v1320_v52, %v3232_v56  ;;  %v942_v56 = vsel %vm3363_vm11, %v2157_v45, %v941_v48  ;;  %v1098_v44 = vpop.permute.xlu1 %1097  ;;  %v951_v52 = vrot.slane %v2389_v60, 6  ;;  %v892_v45 = vrot.slane %v3510_v55, 6 }
  0xae   :  { %2316 = vmatprep.subr.bf16.mxu1 %v2434_v49  ;;  %v1401_v40 = vsel %vm1399_vm14, %v1368_v51, %v3295_v61  ;;  %v1428_v61 = vsel %vm1399_vm14, %v1386_v6, %v1256_v29  ;;  %v2237_v4 = vcombine.low %v942_v56, %v945_v7  ;;  %v1323_v29 = vsel %vm1317_vm12, %v2164_v10, %v3327_v9 }
  0xaf   :  { %1598 = vmatpush1.bf16.msra.mxu0 %v2345_v32  ;;  %v1350_v14 = vsel %vm1317_vm12, %v2173_v19, %v1098_v44  ;;  %v2165_v9 = vcombine.low %v2386_v47, %v2384_v0  ;;  %v1370_v16 = vsel %vm1366_vm13, %v1323_v29, %v3261_v59  ;;  %v894_v7 = vrot.slane %v892_v45, 4  ;;  %v2392_v0 = vld [vmem:[%s3916_s0 + $0x2c] sm:$0x3] }
  0xb0   :  { %1599 = vmatprep.subr.bf16.mxu0 %v2434_v49  ;;  %v3444_v43 = vpop.permute.xlu0 %1243  ;;  %v895_v10 = vrot.slane %v2392_v0, 6  ;;  %v2166_v6 = vcombine.low %v2391_v38, %v3510_v55  ;;  %vm2009_vm6 = vcmask 1045509   ;;  %vm2011_vm7 = vcmask 1046534  }
  0xb1   :  { %2326 = vmatpush1.bf16.msra.mxu1 %v2345_v32  ;;  %v948_v32 = vrot.slane %v3475_v33, 6  ;;  %v1326_v59 = vsel %vm1317_vm12, %v2165_v9, %v3331_v30  ;;  %vm2013_vm8 = vcmask 1047559  }
  0xb2   :  { %2317 = vmatprep.subr.bf16.mxu1 %v2434_v49  ;;  %v1372_v60 = vsel %vm1366_vm13, %v1326_v59, %v3253_v15 }
  0xb3   :  { %1600 = vmatpush1.bf16.msra.mxu0 %v2346_v5  ;;  %v950_v26 = vrot.slane %v948_v32, 4 }
  0xb4   :  { %1601 = vmatprep.subr.bf16.mxu0 %v2434_v49 }
  0xb5   :  { %2327 = vmatpush1.bf16.msra.mxu1 %v2346_v5  ;;  %v2387_v5 = vld [vmem:[%s3916_s0 + $0x20] sm:$0x3]  ;;  %v1178_v48 = vpop.permute.xlu0 %1177 }
  0xb6   :  { %2318 = vmatprep.subr.bf16.mxu1 %v2434_v49  ;;  %v2228_v49 = vcombine.low %v879_v25, %v882_v28  ;;  %v888_v54 = vrot.slane %v2387_v5, 6  ;;  %v949_v25 = vsel %vm3363_vm11, %v2158_v23, %v948_v32  ;;  %v952_v28 = vsel %vm3363_vm11, %v950_v26, %v951_v52  ;;  %v2394_v52 = vld [vmem:[%s3916_s0 + $0x30] sm:$0xf] }
  0xb7   :  { %1602 = vmatpush1.bf16.msra.mxu0 %v2349_v36  ;;  %v3514_v8 = vpop.permute.xlu1 %1085  ;;  %v1388_v56 = vsel %vm1366_vm13, %v1350_v14, %v1178_v48  ;;  %v1404_v32 = vsel %vm1399_vm14, %v1370_v16, %v3351_v2  ;;  %v2238_v44 = vcombine.low %v949_v25, %v952_v28  ;;  %v3548_v2 = vld [vmem:[%s3916_s0 + $0x34] sm:$0xf]  ;;  %v2155_v5 = vrot.slane %v3197_v41, 10  ;;  %v2397_v28 = vld [vmem:[%s3916_s0 + $0x98] sm:$0x3] }
  0xb8   :  { %v889_v62 = vsel %vm3363_vm11, %v887_v20, %v888_v54  ;;  %v899_v30 = vrot.slane %v3548_v2, 6  ;;  %v927_v54 = vrot.slane %v3209_v37, 6  ;;  %v930_v48 = vrot.slane %v3222_v3, 6 }
  0xb9   :  { %2328 = vmatpush1.bf16.msra.mxu1 %v2349_v36  ;;  %v2150_v36 = vrot.slane %v2391_v38, 10  ;;  %v2229_v57 = vcombine.low %v886_v46, %v889_v62  ;;  %v2162_v23 = vrot.slane %v3279_v12, 10  ;;  %v976_v26 = vrot.slane %v3290_v31, 6  ;;  %v3582_v38 = vld [vmem:[%s3916_s0 + $0x90] sm:$0xf]  ;;  %v2365_v12 = vld [vmem:[%s3920_s4 + $0x8] sm:$0xff]  }
  0xba   :  { %1616 = vmatmul.mubr.bf16.vlgmr.msra.gmra.mrb[0].mxu0 %v1401_v40  ;;  %v2171_v40 = vcombine.low %v3197_v41, %v3209_v37  ;;  %v2151_v3 = vrot.slane %v2394_v52, 10  ;;  %v3569_v29 = vsel %vm3363_vm11, %v2155_v5, %v927_v54  ;;  %v929_v46 = vrot.slane %v927_v54, 4  ;;  %v2366_v31 = vld [vmem:[%s3920_s4 + $0x10] sm:$0xff]  }
  0xbb   :  { %2255 = vmatprep.mubr.msk.bf16.mxu0 %vm1317_vm12, %v2228_v49  ;;  %v893_v47 = vsel %vm3363_vm11, %v2150_v36, %v892_v45  ;;  %v3543_v20 = vpop.permute.xlu1 %1165  ;;  %v3576_v15 = vsel %vm3363_vm11, %v2162_v23, %v976_v26  ;;  %v978_v55 = vrot.slane %v976_v26, 4  ;;  %v979_v45 = vrot.slane %v3308_v18, 6  ;;  %v2399_v23 = vld [vmem:[%s3916_s0 + $0x3c] sm:$0xf] }
  0xbc   :  { %1688 = vmatmul.mubr.bf16.vlgmr.msra.gmra.mrb[0].mxu1 %v1428_v61  ;;  %v1258_v51 = vpop.permute.xlu0 %1257  ;;  %v896_v61 = vsel %vm3363_vm11, %v894_v7, %v895_v10  ;;  %v901_v9 = vrot.slane %v899_v30, 4  ;;  %v2159_v36 = vrot.slane %v3582_v38, 10  ;;  %v958_v16 = vrot.slane %v2397_v28, 6 }
  0xbd   :  { %2264 = vmatprep.mubr.msk.bf16.mxu1 %vm1317_vm12, %v2237_v4  ;;  %v1431_v49 = vsel %vm1399_vm14, %v1388_v56, %v1258_v51  ;;  %v955_v4 = vrot.slane %v2936_v24, 6  ;;  %v2395_v24 = vld [vmem:[%s3916_s0 + $0x38] sm:$0x3]  ;;  %v2230_v14 = vcombine.low %v893_v47, %v896_v61  ;;  %v3587_v51 = vsel %vm3363_vm11, %v929_v46, %v930_v48 }
  0xbe   :  { %v902_v62 = vrot.slane %v2395_v24, 6  ;;  %v2235_v18 = vcombine.low %v3569_v29, %v3587_v51  ;;  %v1407_v56 = vsel %vm1399_vm14, %v1372_v60, %v3355_v17  ;;  %v2174_v7 = vcombine.low %v3494_v50, %v3475_v33  ;;  %v2398_v33 = vld [vmem:[%s3916_s0 + $0x40] sm:$0xf]  ;;  %v2400_v60 = vld [vmem:[%s3916_s0 + $0x44] sm:$0x3] }
  0xbf   :  { %v957_v25 = vrot.slane %v955_v4, 4  ;;  %v906_v50 = vrot.slane %v2398_v33, 6  ;;  %v956_v59 = vsel %vm3363_vm11, %v2159_v36, %v955_v4  ;;  %v2152_v26 = vrot.slane %v2399_v23, 10  ;;  %v2402_v36 = vld [vmem:[%s3916_s0 + $0x48] sm:$0xf] }
  0xc0   :  { %v903_v17 = vsel %vm3363_vm11, %v901_v9, %v902_v62  ;;  %v2167_v46 = vcombine.low %v2394_v52, %v3548_v2  ;;  %v2401_v2 = vld [vmem:[%s3916_s0 + $0x4c] sm:$0xf] }
  0xc1   :  { %v1100_v0 = vpop.permute.xlu1 %1099  ;;  %v959_v47 = vsel %vm3363_vm11, %v957_v25, %v958_v16  ;;  %v908_v4 = vrot.slane %v906_v50, 4  ;;  %v907_v62 = vsel %vm3363_vm11, %v2152_v26, %v906_v50  ;;  %v913_v52 = vrot.slane %v2401_v2, 6 }
  0xc2   :  { %1624 = vmatmul.mubr.bf16.gmra.mrb[4].mxu0 %v1404_v32  ;;  %v2239_v54 = vcombine.low %v956_v59, %v959_v47  ;;  %v2153_v25 = vrot.slane %v2402_v36, 10  ;;  %v2169_v26 = vcombine.low %v2402_v36, %v2401_v2 }
  0xc3   :  { %2256 = vmatprep.mubr.msk.bf16.mxu0 %vm1317_vm12, %v2229_v57  ;;  %v3596_v57 = vsel %vm3363_vm11, %v978_v55, %v979_v45 }
  0xc4   :  { %1696 = vmatmul.mubr.bf16.gmra.mrb[4].mxu1 %v1431_v49  ;;  %v3556_v19 = vpop.permute.xlu0 %1245  ;;  %v2242_v10 = vcombine.low %v3576_v15, %v3596_v57  ;;  %v1329_v49 = vsel %vm1317_vm12, %v2166_v6, %v3408_v34  ;;  %v1353_v34 = vsel %vm1317_vm12, %v2174_v7, %v1100_v0  ;;  %v2403_v7 = vld [vmem:[%s3916_s0 + $0x50] sm:$0x3]  ;;  %v2364_v57 = vld [vmem:[%s3920_s4] sm:$0xff]  }
  0xc5   :  { %2265 = vmatprep.mubr.msk.bf16.mxu1 %vm1317_vm12, %v2238_v44  ;;  %v900_v44 = vsel %vm3363_vm11, %v2151_v3, %v899_v30  ;;  %v1374_v6 = vsel %vm1366_vm13, %v1329_v49, %v3441_v63  ;;  %v909_v3 = vrot.slane %v2400_v60, 6  ;;  %v916_v0 = vrot.slane %v2403_v7, 6 }
  0xc6   :  { %v2231_v30 = vcombine.low %v900_v44, %v903_v17  ;;  %v1410_v63 = vsel %vm1399_vm14, %v1374_v6, %v3444_v43  ;;  %v1332_v43 = vsel %vm1317_vm12, %v2167_v46, %v3514_v8  ;;  %v962_v8 = vrot.slane %v3046_v27, 6 }
  0xc7   :  { %v910_v55 = vsel %vm3363_vm11, %v908_v4, %v909_v3  ;;  %v1376_v28 = vsel %vm1366_vm13, %v1332_v43, %v3543_v20  ;;  %v2160_v20 = vrot.slane %v3034_v21, 10  ;;  %v914_v17 = vsel %vm3363_vm11, %v2153_v25, %v913_v52 }
  0xc8   :  { %v1180_v32 = vpop.permute.xlu0 %1179  ;;  %v2232_v9 = vcombine.low %v907_v62, %v910_v55  ;;  %v964_v50 = vrot.slane %v962_v8, 4  ;;  %v965_v27 = vrot.slane %v3057_v53, 6  ;;  %v920_v21 = vrot.slane %v3095_v35, 6 }
  0xc9   :  { %v1390_v48 = vsel %vm1366_vm13, %v1353_v34, %v1180_v32  ;;  %v1413_v32 = vsel %vm1399_vm14, %v1376_v28, %v3556_v19  ;;  %v2404_v19 = vld [vmem:[%s3916_s0 + $0x94] sm:$0xf]  ;;  %v972_v25 = vrot.slane %v3169_v42, 6  ;;  %v2405_v28 = vld [vmem:[%s3916_s0 + $0x9c] sm:$0xf] }
  0xca   :  { %1632 = vmatmul.mubr.bf16.gmra.mrb[8].mxu0 %v1407_v56  ;;  %v915_v56 = vrot.slane %v913_v52, 4  ;;  %v2175_v59 = vcombine.low %v3582_v38, %v2404_v19  ;;  %v966_v53 = vsel %vm3363_vm11, %v964_v50, %v965_v27  ;;  %v2154_v38 = vrot.slane %v3085_v13, 10 }
  0xcb   :  { %2257 = vmatprep.mubr.msk.bf16.mxu0 %vm1317_vm12, %v2230_v14  ;;  %v1088_v5 = vpop.permute.xlu1 %1087  ;;  %v2168_v14 = vcombine.low %v2399_v23, %v2398_v33  ;;  %v923_v23 = vrot.slane %v3105_v1, 6 }
  0xcc   :  { %v917_v33 = vsel %vm3363_vm11, %v915_v56, %v916_v0 }
  0xcd   :  { %v1335_v49 = vsel %vm1317_vm12, %v2168_v14, %v1088_v5  ;;  %v963_v5 = vsel %vm3363_vm11, %v2160_v20, %v962_v8 }
  0xce   :  { %v2240_v4 = vcombine.low %v963_v5, %v966_v53 }
  0xcf   :  { %v1168_v45 = vpop.permute.xlu1 %1167 }
  0xd0   :  { %v1260_v61 = vpop.permute.xlu0 %1259  ;;  %v1378_v47 = vsel %vm1366_vm13, %v1335_v49, %v1168_v45  ;;  %v969_v45 = vrot.slane %v3157_v39, 6 }
  0xd1   :  { %v1434_v24 = vsel %vm1399_vm14, %v1390_v48, %v1260_v61  ;;  %v922_v61 = vrot.slane %v920_v21, 4 }
  0xd2   :  { %1640 = vmatmul.mubr.bf16.gmra.mrb[12].mxu0 %v1410_v63  ;;  %1704 = vmatmul.mubr.bf16.gmra.mrb[8].mxu1 %v1434_v24  ;;  %v921_v63 = vsel %vm3363_vm11, %v2154_v38, %v920_v21  ;;  %v971_v36 = vrot.slane %v969_v45, 4  ;;  %v2369_v38 = vld [vmem:[%s3920_s4 + $0x28] sm:$0xff]  }
  0xd3   :  { %2258 = vmatprep.mubr.msk.bf16.mxu0 %vm1317_vm12, %v2231_v30  ;;  %2266 = vmatprep.mubr.msk.bf16.mxu1 %vm1317_vm12, %v2239_v54  ;;  %v2233_v30 = vcombine.low %v914_v17, %v917_v33  ;;  %v924_v24 = vsel %vm3363_vm11, %v922_v61, %v923_v23  ;;  %v2370_v61 = vld [vmem:[%s3920_s4 + $0x30] sm:$0xff]   ;;  %v1776_v23 = vlaneseq }
  0xd4   :  { %v2234_v1 = vcombine.low %v921_v63, %v924_v24  ;;  %v2270_v24 = vld [vmem:[%s3919_s3] ss:$0 sm:$0xff] }
  0xd5   :  { %v1102_v44 = vpop.permute.xlu1 %1101 }
  0xd6   :  { %v1356_v54 = vsel %vm1317_vm12, %v2175_v59, %v1102_v44  ;;  %v2170_v44 = vcombine.low %v3085_v13, %v3095_v35  ;;  %v2177_v13 = vcombine.low %v3150_v11, %v3157_v39 }
  0xd8   :  { %v1248_v16 = vpop.permute.xlu0 %1247 }
  0xd9   :  { %v1416_v6 = vsel %vm1399_vm14, %v1378_v47, %v1248_v16  ;;  %v2406_v16 = vld [vmem:[%s3916_s0 + $0xa0] sm:$0xf] }
  0xda   :  { %1648 = vmatmul.mubr.bf16.gmra.mrb[16].mxu0 %v1413_v32  ;;  %v2176_v56 = vcombine.low %v2405_v28, %v2406_v16  ;;  %v973_v32 = vsel %vm3363_vm11, %v971_v36, %v972_v25 }
  0xdb   :  { %2259 = vmatprep.mubr.msk.bf16.mxu0 %vm1317_vm12, %v2232_v9  ;;  %v2161_v9 = vrot.slane %v3150_v11, 10 }
  0xdc   :  { %v1182_v34 = vpop.permute.xlu0 %1181 }
  0xdd   :  { %v1392_v60 = vsel %vm1366_vm13, %v1356_v54, %v1182_v34  ;;  %v970_v8 = vsel %vm3363_vm11, %v2161_v9, %v969_v45 }
  0xde   :  { %v1090_v48 = vpop.permute.xlu1 %1089  ;;  %v2241_v42 = vcombine.low %v970_v8, %v973_v32 }
  0xdf   :  { %v1338_v62 = vsel %vm1317_vm12, %v2169_v26, %v1090_v48  ;;  %v2368_v48 = vld [vmem:[%s3920_s4 + $0x20] sm:$0xff]   ;;  %v2371_v26 = vld [vmem:[%s3920_s4 + $0x38] sm:$0xff]  }
  0xe2   :  { %1656 = vmatmul.mubr.bf16.gmra.mrb[20].mxu0 %v1416_v6  ;;  %v1170_v55 = vpop.permute.xlu1 %1169 }
  0xe3   :  { %2260 = vmatprep.mubr.msk.bf16.mxu0 %vm1317_vm12, %v2233_v30  ;;  %v1380_v2 = vsel %vm1366_vm13, %v1338_v62, %v1170_v55 }
  0xe4   :  { %v1262_v3 = vpop.permute.xlu0 %1261 }
  0xe5   :  { %v1437_v46 = vsel %vm1399_vm14, %v1392_v60, %v1262_v3  ;;  %v3762_v60 = vld [vmem:[%s3918_s2] ss:$0 sm:$0xff] }
  0xe6   :  { %1712 = vmatmul.mubr.bf16.gmra.mrb[12].mxu1 %v1437_v46 }
  0xe7   :  { %2267 = vmatprep.mubr.msk.bf16.mxu1 %vm1317_vm12, %v2240_v4  ;;  %v1777_v4 = vshrl.u32 %v1776_v23, 7 }
  0xe9   :  { %v1104_v14 = vpop.permute.xlu1 %1103  ;;  %v1778_v46 = vadd.s32 8, %v1777_v4  ;;  %vm3770_vm0 = vcmp.lt.s32.totalorder %v1777_v4, %v2270_v24 }
  0xea   :  { %v1250_v52 = vpop.permute.xlu0 %1249  ;;  %v1359_v49 = vsel %vm1317_vm12, %v2176_v56, %v1104_v14 }
  0xeb   :  { %v1419_v43 = vsel %vm1399_vm14, %v1380_v2, %v1250_v52  ;;  %vm3774_vm1 = vcmp.lt.s32.totalorder %v1778_v46, %v2270_v24 }
  0xec   :  { %1664 = vmatmul.mubr.bf16.gmra.mrb[24].mxu0 %v1419_v43 }
  0xed   :  { %2261 = vmatprep.mubr.msk.bf16.mxu0 %vm1317_vm12, %v2234_v1 }
  0xef   :  { %v1184_v7 = vpop.permute.xlu0 %1183 }
  0xf0   :  { %v1394_v20 = vsel %vm1366_vm13, %v1359_v49, %v1184_v7 }
  0xf2   :  { %v1092_v0 = vpop.permute.xlu1 %1091 }
  0xf3   :  { %v1341_v27 = vsel %vm1317_vm12, %v2170_v44, %v1092_v0 }
  0xf6   :  { %v1172_v50 = vpop.permute.xlu1 %1171 }
  0xf7   :  { %v1264_v17 = vpop.permute.xlu0 %1263  ;;  %v1382_v22 = vsel %vm1366_vm13, %v1341_v27, %v1172_v50 }
  0xf8   :  { %v1440_v33 = vsel %vm1399_vm14, %v1394_v20, %v1264_v17 }
  0xf9   :  { %1720 = vmatmul.mubr.bf16.gmra.mrb[16].mxu1 %v1440_v33 }
  0xfa   :  { %2268 = vmatprep.mubr.msk.bf16.mxu1 %vm1317_vm12, %v2241_v42 }
  0xfc   :  { %v1106_v59 = vpop.permute.xlu1 %1105 }
  0xfd   :  { %v1362_v21 = vsel %vm1317_vm12, %v2177_v13, %v1106_v59 }
  0xfe   :  { %v1252_v19 = vpop.permute.xlu0 %1251 }
  0xff   :  { %v1422_v47 = vsel %vm1399_vm14, %v1382_v22, %v1252_v19 }
 0x100   :  { %1672 = vmatmul.mubr.bf16.gmra.mrb[28].mxu0 %v1422_v47 }
 0x101   :  { %2262 = vmatprep.mubr.msk.bf16.mxu0 %vm1317_vm12, %v2235_v18 }
 0x103   :  { %v1186_v35 = vpop.permute.xlu0 %1185 }
 0x104   :  { %v1396_v6 = vsel %vm1366_vm13, %v1362_v21, %v1186_v35 }
 0x105   :  { %v1094_v34 = vpop.permute.xlu1 %1093 }
 0x106   :  { %v1344_v5 = vsel %vm1317_vm12, %v2171_v40, %v1094_v34 }
 0x109   :  { %v1174_v53 = vpop.permute.xlu1 %1173 }
 0x10a   :  { %v1266_v30 = vpop.permute.xlu0 %1265  ;;  %v1384_v11 = vsel %vm1366_vm13, %v1344_v5, %v1174_v53 }
 0x10b   :  { %v1443_v29 = vsel %vm1399_vm14, %v1396_v6, %v1266_v30 }
 0x10c   :  { %1728 = vmatmul.mubr.bf16.gmra.mrb[20].mxu1 %v1443_v29 }
 0x10d   :  { %2269 = vmatprep.mubr.msk.bf16.mxu1 %vm1317_vm12, %v2242_v10  ;;  %v2435_v10 = vmov 0.0  }
 0x10e   :  { %v1254_v39 = vpop.permute.xlu0 %1253  ;;  %2289 = vmatprep.subr.bf16.mxu1 %v2435_v10 }
 0x10f   :  { %v1425_v51 = vsel %vm1399_vm14, %v1384_v11, %v1254_v39  ;;  %2290 = vmatpush3.bf16.msra.mxu1 %v2364_v57 }
 0x110   :  { %1680 = vmatmul.mubr.bf16.gmra.mrb[32].mxu0 %v1425_v51  ;;  %2291 = vmatprep.subr.bf16.mxu1 %v2435_v10 }
 0x112   :  { %v1188_v18 = vpop.permute.xlu0 %1187 }
 0x113   :  { %2292 = vmatpush3.bf16.msra.mxu1 %v2365_v12 }
 0x114   :  { %v1108_v54 = vpop.permute.xlu1 %1107  ;;  %2293 = vmatprep.subr.bf16.mxu1 %v2435_v10 }
 0x115   :  { %v1365_v41 = vsel %vm1317_vm12, %v2178_v58, %v1108_v54  ;;  %v2367_v58 = vld [vmem:[%s3920_s4 + $0x18] sm:$0xff]   ;;  %s2437_s4 = smov [#allocation2]  }
 0x116   :  { %v1398_v37 = vsel %vm1366_vm13, %v1365_v41, %v1188_v18  ;;  %s2120_s15 = sshll.u32 %s2437_s4, 4  ;;  %s2121_s15 = int_to_ptr.vmem [resolvable:$true] %s2120_s15 }
 0x117   :  { %2294 = vmatpush3.bf16.msra.mxu1 %v2366_v31  ;;  %s2407_s22 = scalar_lea.vmem %s2121_s15, 256  ;;  %p2412_p1 = scmp.lt.s32.totalorder %s2121_s15, %s2121_s15 }
 0x118   :  { %v1268_v40 = vpop.permute.xlu1 %1267  ;;  %2295 = vmatprep.subr.bf16.mxu1 %v2435_v10  ;;  %p2408_p0 = scmp.ne.s32.totalorder %s2121_s15, %s2407_s22  ;;  %p2413_p2 = scmp.lt.s32.totalorder %s2407_s22, %s2407_s22 }
 0x119   :  { %v1446_v15 = vsel %vm1399_vm14, %v1398_v37, %v1268_v40 }
 0x11a   :  { %1736 = vmatmul.mubr.bf16.gmra.mrb[24].mxu1 %v1446_v15  ;;  %p2414_p3 = por %p2413_p2, %p2412_p1 }
 0x11b   :  { %2296 = vmatpush3.bf16.msra.mxu1 %v2367_v58  ;;  %2305 = vmatprep.mubr.msk.bf16.mxu1 %vm2436_vm15, %v2435_v10 }
 0x11c   :  { %2297 = vmatprep.subr.bf16.mxu1 %v2435_v10  ;;  %p2415_p4 = pnand %p2414_p3, %p2408_p0 }
 0x11f   :  { %2298 = vmatpush3.bf16.msra.mxu1 %v2368_v48 }
 0x120   :  { %2299 = vmatprep.subr.bf16.mxu1 %v2435_v10 }
 0x123   :  { %2300 = vmatpush3.bf16.msra.mxu1 %v2369_v38 }
 0x124   :  { %2301 = vmatprep.subr.bf16.mxu1 %v2435_v10 }
 0x127   :  { %2302 = vmatpush3.bf16.msra.mxu1 %v2370_v61 }
 0x128   :  { %2303 = vmatprep.subr.bf16.mxu1 %v2435_v10 }
 0x12b   :  { %2304 = vmatpush3.bf16.msra.mxu1 %v2371_v26 }
 0x18d   :  { %v1617_v3 = vpop.f32.mrb[0].mxu0 }
 0x18e   :  { %v1618_v63 = vadd.f32 %v3762_v60, %v1617_v3  ;;  %v1619_v62 = vpop.f32.mrb[1].mxu0 }
 0x18f   :  { %v1620_v55 = vpop.f32.mrb[2].mxu0  ;;  %v1689_v1 = vpop.f32.mrb[0].mxu1 }
 0x190   :  { %v1744_v2 = vmax.f32 %v1618_v63, 0.0  ;;  %v1621_v52 = vadd.f32 %v3762_v60, %v1620_v55  ;;  %v1622_v43 = vpop.f32.mrb[3].mxu0  ;;  %v1690_v45 = vadd.f32 %v3762_v60, %v1689_v1  ;;  %v1691_v14 = vpop.f32.mrb[1].mxu1 }
 0x191   :  { %v1692_v25 = vpop.f32.mrb[2].mxu1 }
 0x192   :  { %v1745_v28 = vmax.f32 %v1621_v52, 0.0  ;;  %v1762_v16 = vmax.f32 %v1690_v45, 0.0  ;;  %v1693_v56 = vadd.f32 %v3762_v60, %v1692_v25  ;;  %v1694_v7 = vpop.f32.mrb[3].mxu1  ;;  %v1786_v0 = vsel %vm3770_vm0, %v1744_v2, 0.0 }
 0x194   :  { %v1787_v8 = vsel %vm3774_vm1, %v1745_v28, 0.0  ;;  %v1763_v32 = vmax.f32 %v1693_v56, 0.0  ;;  %v1804_v17 = vsel %vm3770_vm0, %v1762_v16, 0.0 }
 0x195   :  { %v1818_v49 = vmax.f32 %v1786_v0, %v1787_v8  ;;  %v1625_v42 = vpop.f32.mrb[4].mxu0 }
 0x196   :  { %v1626_v44 = vadd.f32 %v3762_v60, %v1625_v42  ;;  %v1627_v20 = vpop.f32.mrb[5].mxu0  ;;  %v1805_v33 = vsel %vm3774_vm1, %v1763_v32, 0.0 }
 0x197   :  { %v1819_v50 = vrot.slane %v1818_v49, 4  ;;  %v1628_v27 = vpop.f32.mrb[6].mxu0  ;;  %v3788_v22 = vmax.f32 %v1804_v17, %v1805_v33  ;;  %v1697_v19 = vpop.f32.mrb[4].mxu1 }
 0x198   :  { %v1746_v59 = vmax.f32 %v1626_v44, 0.0  ;;  %v1629_v47 = vadd.f32 %v3762_v60, %v1628_v27  ;;  %v1630_v13 = vpop.f32.mrb[7].mxu0  ;;  %v1698_v35 = vadd.f32 %v3762_v60, %v1697_v19  ;;  %v1699_v34 = vpop.f32.mrb[5].mxu1 }
 0x199   :  { %v1820_v21 = vmax.f32 %v1818_v49, %v1819_v50  ;;  %v1700_v6 = vpop.f32.mrb[6].mxu1 }
 0x19a   :  { %v1747_v30 = vmax.f32 %v1629_v47, 0.0  ;;  %v1764_v5 = vmax.f32 %v1698_v35, 0.0  ;;  %v1701_v53 = vadd.f32 %v3762_v60, %v1700_v6  ;;  %v1702_v29 = vpop.f32.mrb[7].mxu1  ;;  %v1788_v39 = vsel %vm3770_vm0, %v1746_v59, 0.0 }
 0x19b   :  { %v1821_v11 = vrot.slane %v1820_v21, 2 }
 0x19c   :  { %v1789_v51 = vsel %vm3774_vm1, %v1747_v30, 0.0  ;;  %v1765_v18 = vmax.f32 %v1701_v53, 0.0  ;;  %v1806_v57 = vsel %vm3770_vm0, %v1764_v5, 0.0 }
 0x19d   :  { %v1822_v54 = vmax.f32 %v1820_v21, %v1821_v11  ;;  %v1825_v41 = vmax.f32 %v1788_v39, %v1789_v51  ;;  %v1633_v37 = vpop.f32.mrb[8].mxu0 }
 0x19e   :  { %v1634_v40 = vadd.f32 %v3762_v60, %v1633_v37  ;;  %v1635_v15 = vpop.f32.mrb[9].mxu0  ;;  %v1807_v10 = vsel %vm3774_vm1, %v1765_v18, 0.0 }
 0x19f   :  { %v1826_v12 = vrot.slane %v1825_v41, 4  ;;  %v1636_v31 = vpop.f32.mrb[10].mxu0  ;;  %v3802_v58 = vmax.f32 %v1806_v57, %v1807_v10  ;;  %v1823_v48 = vrot.slane %v1822_v54, 1 }
 0x1a0   :  { %v1748_v38 = vmax.f32 %v1634_v40, 0.0  ;;  %v1637_v61 = vadd.f32 %v3762_v60, %v1636_v31  ;;  %v1638_v23 = vpop.f32.mrb[11].mxu0 }
 0x1a1   :  { %v1827_v26 = vmax.f32 %v1825_v41, %v1826_v12  ;;  %v1824_v46 = vmax.f32 %v1822_v54, %v1823_v48 }
 0x1a2   :  { %v1749_v4 = vmax.f32 %v1637_v61, 0.0  ;;  %v1790_v63 = vsel %vm3770_vm0, %v1748_v38, 0.0 }
 0x1a3   :  { %v1828_v3 = vrot.slane %v1827_v26, 2  ;;  %v1930_v7 = vpack.c.bf16 %v1824_v46, %v1824_v46 }
 0x1a4   :  { %v1791_v24 = vsel %vm3774_vm1, %v1749_v4, 0.0 }
 0x1a5   :  { %v1829_v62 = vmax.f32 %v1827_v26, %v1828_v3  ;;  %v1832_v55 = vmax.f32 %v1790_v63, %v1791_v24  ;;  %v1641_v1 = vpop.f32.mrb[12].mxu0  ;;  %v1705_v2 = vpop.f32.mrb[8].mxu1  ;;  %v1985_v59 = vunpack.c.l.b16 %v1930_v7 }
 0x1a6   :  { %v1642_v52 = vadd.f32 %v3762_v60, %v1641_v1  ;;  %v1643_v43 = vpop.f32.mrb[13].mxu0  ;;  %v1706_v45 = vadd.f32 %v3762_v60, %v1705_v2  ;;  %v1707_v14 = vpop.f32.mrb[9].mxu1 }
 0x1a7   :  { %v1830_v25 = vrot.slane %v1829_v62, 1  ;;  %v1833_v28 = vrot.slane %v1832_v55, 4  ;;  %v1644_v16 = vpop.f32.mrb[14].mxu0  ;;  %v1708_v56 = vpop.f32.mrb[10].mxu1 }
 0x1a8   :  { %v1750_v0 = vmax.f32 %v1642_v52, 0.0  ;;  %v1645_v8 = vadd.f32 %v3762_v60, %v1644_v16  ;;  %v1646_v32 = vpop.f32.mrb[15].mxu0  ;;  %v1766_v49 = vmax.f32 %v1706_v45, 0.0  ;;  %v1710_v42 = vpop.f32.mrb[11].mxu1  ;;  %v1709_v17 = vadd.f32 %v3762_v60, %v1708_v56 }
 0x1a9   :  { %v1831_v44 = vmax.f32 %v1829_v62, %v1830_v25  ;;  %v1834_v20 = vmax.f32 %v1832_v55, %v1833_v28 }
 0x1aa   :  { %v1751_v33 = vmax.f32 %v1645_v8, 0.0  ;;  %v1767_v19 = vmax.f32 %v1709_v17, 0.0  ;;  %v1792_v47 = vsel %vm3770_vm0, %v1750_v0, 0.0  ;;  %v1808_v35 = vsel %vm3770_vm0, %v1766_v49, 0.0 }
 0x1ab   :  { %v1931_v50 = vpack.c.bf16 %v1831_v44, %v1831_v44  ;;  %v1835_v27 = vrot.slane %v1834_v20, 2 }
 0x1ac   :  { %v1793_v13 = vsel %vm3774_vm1, %v1751_v33, 0.0  ;;  %v1809_v5 = vsel %vm3774_vm1, %v1767_v19, 0.0 }
 0x1ad   :  { %v1986_v34 = vunpack.c.l.b16 %v1931_v50  ;;  %v1836_v21 = vmax.f32 %v1834_v20, %v1835_v27  ;;  %v1839_v6 = vmax.f32 %v1792_v47, %v1793_v13  ;;  %v1649_v30 = vpop.f32.mrb[16].mxu0  ;;  %v3822_v11 = vmax.f32 %v1808_v35, %v1809_v5 }
 0x1ae   :  { %v1650_v53 = vadd.f32 %v3762_v60, %v1649_v30  ;;  %v1651_v29 = vpop.f32.mrb[17].mxu0 }
 0x1af   :  { %v2002_v39 = vsel %vm2001_vm2, %v1986_v34, %v1985_v59  ;;  %v1837_v51 = vrot.slane %v1836_v21, 1  ;;  %v1840_v18 = vrot.slane %v1839_v6, 4  ;;  %v1652_v54 = vpop.f32.mrb[18].mxu0 }
 0x1b0   :  { %v1752_v41 = vmax.f32 %v1650_v53, 0.0  ;;  %v1653_v37 = vadd.f32 %v3762_v60, %v1652_v54  ;;  %v1654_v40 = vpop.f32.mrb[19].mxu0 }
 0x1b1   :  { %v1838_v15 = vmax.f32 %v1836_v21, %v1837_v51  ;;  %v1841_v57 = vmax.f32 %v1839_v6, %v1840_v18 }
 0x1b2   :  { %v1753_v10 = vmax.f32 %v1653_v37, 0.0  ;;  %v1794_v48 = vsel %vm3770_vm0, %v1752_v41, 0.0 }
 0x1b3   :  { %v1932_v12 = vpack.c.bf16 %v1838_v15, %v1838_v15  ;;  %v1842_v31 = vrot.slane %v1841_v57, 2 }
 0x1b4   :  { %v1795_v38 = vsel %vm3774_vm1, %v1753_v10, 0.0 }
 0x1b5   :  { %v1987_v61 = vunpack.c.l.b16 %v1932_v12  ;;  %v1843_v23 = vmax.f32 %v1841_v57, %v1842_v31  ;;  %v1846_v26 = vmax.f32 %v1794_v48, %v1795_v38  ;;  %v1657_v4 = vpop.f32.mrb[20].mxu0 }
 0x1b6   :  { %v1658_v3 = vadd.f32 %v3762_v60, %v1657_v4  ;;  %v1659_v46 = vpop.f32.mrb[21].mxu0 }
 0x1b7   :  { %v2004_v63 = vsel %vm2003_vm3, %v1987_v61, %v2002_v39  ;;  %v1844_v24 = vrot.slane %v1843_v23, 1  ;;  %v1847_v62 = vrot.slane %v1846_v26, 4  ;;  %v1660_v55 = vpop.f32.mrb[22].mxu0 }
 0x1b8   :  { %v1754_v1 = vmax.f32 %v1658_v3, 0.0  ;;  %v1661_v2 = vadd.f32 %v3762_v60, %v1660_v55  ;;  %v1662_v52 = vpop.f32.mrb[23].mxu0 }
 0x1b9   :  { %v1845_v43 = vmax.f32 %v1843_v23, %v1844_v24  ;;  %v1848_v45 = vmax.f32 %v1846_v26, %v1847_v62  ;;  %v1713_v14 = vpop.f32.mrb[12].mxu1 }
 0x1ba   :  { %v1755_v25 = vmax.f32 %v1661_v2, 0.0  ;;  %v1714_v28 = vadd.f32 %v3762_v60, %v1713_v14  ;;  %v1715_v16 = vpop.f32.mrb[13].mxu1  ;;  %v1796_v8 = vsel %vm3770_vm0, %v1754_v1, 0.0 }
 0x1bb   :  { %v1933_v56 = vpack.c.bf16 %v1845_v43, %v1845_v43  ;;  %v1849_v7 = vrot.slane %v1848_v45, 2  ;;  %v1716_v0 = vpop.f32.mrb[14].mxu1 }
 0x1bc   :  { %v1797_v32 = vsel %vm3774_vm1, %v1755_v25, 0.0  ;;  %v1768_v49 = vmax.f32 %v1714_v28, 0.0  ;;  %v1717_v42 = vadd.f32 %v3762_v60, %v1716_v0  ;;  %v1718_v44 = vpop.f32.mrb[15].mxu1 }
 0x1bd   :  { %v1988_v20 = vunpack.c.l.b16 %v1933_v56  ;;  %v1850_v17 = vmax.f32 %v1848_v45, %v1849_v7  ;;  %v1853_v33 = vmax.f32 %v1796_v8, %v1797_v32 }
 0x1be   :  { %v1769_v50 = vmax.f32 %v1717_v42, 0.0  ;;  %v1810_v13 = vsel %vm3770_vm0, %v1768_v49, 0.0 }
 0x1bf   :  { %v2006_v27 = vsel %vm2005_vm4, %v1988_v20, %v2004_v63  ;;  %v1851_v19 = vrot.slane %v1850_v17, 1  ;;  %v1854_v59 = vrot.slane %v1853_v33, 4  ;;  %v1665_v47 = vpop.f32.mrb[24].mxu0 }
 0x1c0   :  { %v1811_v35 = vsel %vm3774_vm1, %v1769_v50, 0.0  ;;  %v1666_v34 = vadd.f32 %v3762_v60, %v1665_v47  ;;  %v1667_v21 = vpop.f32.mrb[25].mxu0 }
 0x1c1   :  { %v1852_v6 = vmax.f32 %v1850_v17, %v1851_v19  ;;  %v1855_v30 = vmax.f32 %v1853_v33, %v1854_v59  ;;  %v3845_v5 = vmax.f32 %v1810_v13, %v1811_v35  ;;  %v1668_v53 = vpop.f32.mrb[26].mxu0  ;;  %v1882_v59 = vrot.slane %v3788_v22, 4 }
 0x1c2   :  { %v1756_v29 = vmax.f32 %v1666_v34, 0.0  ;;  %v1669_v39 = vadd.f32 %v3762_v60, %v1668_v53  ;;  %v1670_v51 = vpop.f32.mrb[27].mxu0  ;;  %v1889_v34 = vrot.slane %v3802_v58, 4  ;;  %v1896_v53 = vrot.slane %v3822_v11, 4 }
 0x1c3   :  { %v1934_v18 = vpack.c.bf16 %v1852_v6, %v1852_v6  ;;  %v1856_v54 = vrot.slane %v1855_v30, 2 }
 0x1c4   :  { %v1757_v41 = vmax.f32 %v1669_v39, 0.0  ;;  %v1798_v15 = vsel %vm3770_vm0, %v1756_v29, 0.0  ;;  %v1903_v29 = vrot.slane %v3845_v5, 4 }
 0x1c5   :  { %v1989_v37 = vunpack.c.l.b16 %v1934_v18  ;;  %v1857_v40 = vmax.f32 %v1855_v30, %v1856_v54  ;;  %v1883_v30 = vmax.f32 %v3788_v22, %v1882_v59 }
 0x1c6   :  { %v1799_v57 = vsel %vm3774_vm1, %v1757_v41, 0.0 }
 0x1c7   :  { %v2008_v10 = vsel %vm2007_vm5, %v1989_v37, %v2006_v27  ;;  %v1858_v12 = vrot.slane %v1857_v40, 1  ;;  %v1860_v31 = vmax.f32 %v1798_v15, %v1799_v57  ;;  %v1890_v57 = vmax.f32 %v3802_v58, %v1889_v34 }
 0x1c8   :  { %v1884_v22 = vrot.slane %v1883_v30, 2 }
 0x1c9   :  { %v1859_v48 = vmax.f32 %v1857_v40, %v1858_v12  ;;  %v1861_v38 = vrot.slane %v1860_v31, 4 }
 0x1cb   :  { %v1935_v61 = vpack.c.bf16 %v1859_v48, %v1859_v48  ;;  %v1862_v23 = vmax.f32 %v1860_v31, %v1861_v38  ;;  %v1897_v48 = vmax.f32 %v3822_v11, %v1896_v53  ;;  %v1904_v38 = vmax.f32 %v3845_v5, %v1903_v29 }
 0x1cc   :  { %v1721_v26 = vpop.f32.mrb[16].mxu1 }
 0x1cd   :  { %v1990_v4 = vunpack.c.l.b16 %v1935_v61  ;;  %v1863_v3 = vrot.slane %v1862_v23, 2  ;;  %v1722_v46 = vadd.f32 %v3762_v60, %v1721_v26  ;;  %v1723_v63 = vpop.f32.mrb[17].mxu1  ;;  %v1898_v11 = vrot.slane %v1897_v48, 2 }
 0x1ce   :  { %v1724_v24 = vpop.f32.mrb[18].mxu1 }
 0x1cf   :  { %v2010_v62 = vsel %vm2009_vm6, %v1990_v4, %v2008_v10  ;;  %v1864_v55 = vmax.f32 %v1862_v23, %v1863_v3  ;;  %v1726_v1 = vpop.f32.mrb[19].mxu1  ;;  %v1770_v2 = vmax.f32 %v1722_v46, 0.0  ;;  %v1725_v52 = vadd.f32 %v3762_v60, %v1724_v24 }
 0x1d1   :  { %v1865_v43 = vrot.slane %v1864_v55, 1  ;;  %v1771_v45 = vmax.f32 %v1725_v52, 0.0  ;;  %v1812_v28 = vsel %vm3770_vm0, %v1770_v2, 0.0  ;;  %v1885_v52 = vmax.f32 %v1883_v30, %v1884_v22 }
 0x1d3   :  { %v1866_v14 = vmax.f32 %v1864_v55, %v1865_v43  ;;  %v1673_v25 = vpop.f32.mrb[28].mxu0  ;;  %v1813_v16 = vsel %vm3774_vm1, %v1771_v45, 0.0  ;;  %v1891_v55 = vrot.slane %v1890_v57, 2  ;;  %v1905_v43 = vrot.slane %v1904_v38, 2 }
 0x1d4   :  { %v1674_v56 = vadd.f32 %v3762_v60, %v1673_v25  ;;  %v1675_v7 = vpop.f32.mrb[29].mxu0  ;;  %v1909_v8 = vmax.f32 %v1812_v28, %v1813_v16 }
 0x1d5   :  { %v1936_v0 = vpack.c.bf16 %v1866_v14, %v1866_v14  ;;  %v1676_v32 = vpop.f32.mrb[30].mxu0  ;;  %v1892_v7 = vmax.f32 %v1890_v57, %v1891_v55 }
 0x1d6   :  { %v1758_v49 = vmax.f32 %v1674_v56, 0.0  ;;  %v1677_v42 = vadd.f32 %v3762_v60, %v1676_v32  ;;  %v1678_v44 = vpop.f32.mrb[31].mxu0  ;;  %v1910_v37 = vrot.slane %v1909_v8, 4 }
 0x1d7   :  { %v1991_v20 = vunpack.c.l.b16 %v1936_v0  ;;  %v1899_v0 = vmax.f32 %v1897_v48, %v1898_v11  ;;  %v1906_v44 = vmax.f32 %v1904_v38, %v1905_v43 }
 0x1d8   :  { %v1759_v17 = vmax.f32 %v1677_v42, 0.0  ;;  %v1800_v50 = vsel %vm3770_vm0, %v1758_v49, 0.0  ;;  %v1911_v63 = vmax.f32 %v1909_v8, %v1910_v37 }
 0x1d9   :  { %v2012_v33 = vsel %vm2011_vm7, %v1991_v20, %v2010_v62  ;;  %v1907_v53 = vrot.slane %v1906_v44, 1 }
 0x1da   :  { %v1801_v27 = vsel %vm3774_vm1, %v1759_v17, 0.0  ;;  %v1912_v25 = vrot.slane %v1911_v63, 2 }
 0x1db   :  { %v1867_v19 = vmax.f32 %v1800_v50, %v1801_v27  ;;  %v1886_v50 = vrot.slane %v1885_v52, 1 }
 0x1dc   :  { %v1913_v27 = vmax.f32 %v1911_v63, %v1912_v25 }
 0x1dd   :  { %v1868_v47 = vrot.slane %v1867_v19, 4 }
 0x1df   :  { %v1869_v13 = vmax.f32 %v1867_v19, %v1868_v47  ;;  %v1729_v35 = vpop.f32.mrb[20].mxu1  ;;  %v1893_v47 = vrot.slane %v1892_v7, 1 }
 0x1e0   :  { %v1730_v21 = vadd.f32 %v3762_v60, %v1729_v35  ;;  %v1731_v6 = vpop.f32.mrb[21].mxu1 }
 0x1e1   :  { %v1870_v39 = vrot.slane %v1869_v13, 2  ;;  %v1732_v51 = vpop.f32.mrb[22].mxu1  ;;  %v1900_v6 = vrot.slane %v1899_v0, 1 }
 0x1e2   :  { %v1772_v18 = vmax.f32 %v1730_v21, 0.0  ;;  %v1733_v54 = vadd.f32 %v3762_v60, %v1732_v51  ;;  %v1734_v41 = vpop.f32.mrb[23].mxu1 }
 0x1e3   :  { %v1871_v40 = vmax.f32 %v1869_v13, %v1870_v39  ;;  %v1681_v15 = vpop.f32.mrb[32].mxu0  ;;  %v1887_v39 = vmax.f32 %v1885_v52, %v1886_v50 }
 0x1e4   :  { %v1773_v10 = vmax.f32 %v1733_v54, 0.0  ;;  %v1682_v12 = vadd.f32 %v3762_v60, %v1681_v15  ;;  %v1683_v31 = vpop.f32.mrb[33].mxu0  ;;  %v1814_v26 = vsel %vm3770_vm0, %v1772_v18, 0.0  ;;  %v1894_v18 = vmax.f32 %v1892_v7, %v1893_v47 }
 0x1e5   :  { %v1872_v61 = vrot.slane %v1871_v40, 1  ;;  %v1684_v23 = vpop.f32.mrb[34].mxu0 }
 0x1e6   :  { %v1815_v4 = vsel %vm3774_vm1, %v1773_v10, 0.0  ;;  %v1760_v3 = vmax.f32 %v1682_v12, 0.0  ;;  %v1685_v58 = vadd.f32 %v3762_v60, %v1684_v23  ;;  %v1686_v46 = vpop.f32.mrb[35].mxu0  ;;  %v1939_v10 = vpack.c.bf16 %v1887_v39, %v1887_v39 }
 0x1e7   :  { %v1873_v24 = vmax.f32 %v1871_v40, %v1872_v61  ;;  %v1916_v62 = vmax.f32 %v1814_v26, %v1815_v4  ;;  %v1901_v40 = vmax.f32 %v1899_v0, %v1900_v6  ;;  %v1940_v48 = vpack.c.bf16 %v1894_v18, %v1894_v18 }
 0x1e8   :  { %v1761_v1 = vmax.f32 %v1685_v58, 0.0  ;;  %v1802_v45 = vsel %vm3770_vm0, %v1760_v3, 0.0  ;;  %v1994_v3 = vunpack.c.l.b16 %v1939_v10 }
 0x1e9   :  { %v1937_v2 = vpack.c.bf16 %v1873_v24, %v1873_v24  ;;  %v1917_v5 = vrot.slane %v1916_v62, 4  ;;  %v1941_v61 = vpack.c.bf16 %v1901_v40, %v1901_v40  ;;  %v1995_v36 = vunpack.c.l.b16 %v1940_v48 }
 0x1ea   :  { %v1803_v14 = vsel %vm3774_vm1, %v1761_v1, 0.0 }
 0x1eb   :  { %v1992_v28 = vunpack.c.l.b16 %v1937_v2  ;;  %v1918_v16 = vmax.f32 %v1916_v62, %v1917_v5  ;;  %v1874_v56 = vmax.f32 %v1802_v45, %v1803_v14  ;;  %v1996_v24 = vunpack.c.l.b16 %v1941_v61 }
 0x1ed   :  { %v1919_v8 = vrot.slane %v1918_v16, 2  ;;  %v1875_v32 = vrot.slane %v1874_v56, 4  ;;  %v1737_v49 = vpop.f32.mrb[24].mxu1  ;;  %v2014_v42 = vsel %vm2013_vm8, %v1992_v28, %v2012_v33  ;;  %v1914_v33 = vrot.slane %v1913_v27, 1 }
 0x1ee   :  { %v1738_v20 = vadd.f32 %v3762_v60, %v1737_v49  ;;  %v1739_v17 = vpop.f32.mrb[25].mxu1 }
 0x1ef   :  { %v1876_v19 = vmax.f32 %v1874_v56, %v1875_v32  ;;  %v1740_v59 = vpop.f32.mrb[26].mxu1  ;;  %v1920_v13 = vmax.f32 %v1918_v16, %v1919_v8  ;;  %v1915_v12 = vmax.f32 %v1913_v27, %v1914_v33  ;;  %v2271_v8 = vld [vmem:[%s3921_s5] ss:$0 sm:$0xff] }
 0x1f0   :  { %v1774_v35 = vmax.f32 %v1738_v20, 0.0  ;;  %v1741_v34 = vadd.f32 %v3762_v60, %v1740_v59  ;;  %v1742_v21 = vpop.f32.mrb[27].mxu1  ;;  %v1908_v60 = vmax.f32 %v1906_v44, %v1907_v53 }
 0x1f1   :  { %v1877_v30 = vrot.slane %v1876_v19, 2  ;;  %v1921_v54 = vrot.slane %v1920_v13, 1  ;;  %v1943_v9 = vpack.c.bf16 %v1915_v12, %v1915_v12 }
 0x1f2   :  { %v1775_v29 = vmax.f32 %v1741_v34, 0.0  ;;  %v1816_v41 = vsel %vm3770_vm0, %v1774_v35, 0.0  ;;  %v1942_v4 = vpack.c.bf16 %v1908_v60, %v1908_v60 }
 0x1f3   :  { %v1878_v51 = vmax.f32 %v1876_v19, %v1877_v30  ;;  %v1922_v38 = vmax.f32 %v1920_v13, %v1921_v54  ;;  %v1998_v2 = vunpack.c.l.b16 %v1943_v9 }
 0x1f4   :  { %v1817_v37 = vsel %vm3774_vm1, %v1775_v29, 0.0  ;;  %v1997_v1 = vunpack.c.l.b16 %v1942_v4 }
 0x1f5   :  { %v1879_v15 = vrot.slane %v1878_v51, 1  ;;  %v1923_v57 = vmax.f32 %v1816_v41, %v1817_v37  ;;  %v1944_v63 = vpack.c.bf16 %v1922_v38, %v1922_v38 }
 0x1f7   :  { %v1880_v31 = vmax.f32 %v1878_v51, %v1879_v15  ;;  %v1924_v22 = vrot.slane %v1923_v57, 4  ;;  %v1999_v43 = vunpack.c.l.b16 %v1944_v63 }
 0x1f9   :  { %v1938_v23 = vpack.c.bf16 %v1880_v31, %v1880_v31  ;;  %v1925_v26 = vmax.f32 %v1923_v57, %v1924_v22 }
 0x1fb   :  { %v1993_v58 = vunpack.c.l.b16 %v1938_v23  ;;  %v1926_v46 = vrot.slane %v1925_v26, 2 }
 0x1fd   :  { %v2015_v62 = vsel %vm2001_vm2, %v1994_v3, %v1993_v58  ;;  %v1927_v55 = vmax.f32 %v1925_v26, %v1926_v46 }
 0x1fe   :  { %v2016_v11 = vsel %vm2003_vm3, %v1995_v36, %v2015_v62 }
 0x1ff   :  { %v2017_v5 = vsel %vm2005_vm4, %v1996_v24, %v2016_v11  ;;  %v1928_v52 = vrot.slane %v1927_v55, 1 }
 0x200   :  { %v2018_v45 = vsel %vm2007_vm5, %v1997_v1, %v2017_v5 }
 0x201   :  { %v1929_v14 = vmax.f32 %v1927_v55, %v1928_v52  ;;  %v2019_v25 = vsel %vm2009_vm6, %v1998_v2, %v2018_v45 }
 0x202   :  { %v2020_v28 = vsel %vm2011_vm7, %v1999_v43, %v2019_v25 }
 0x203   :  { %v1945_v16 = vpack.c.bf16 %v1929_v14, %v1929_v14 }
 0x205   :  { %v2000_v56 = vunpack.c.l.b16 %v1945_v16 }
 0x207   :  { %v2021_v7 = vsel %vm2013_vm8, %v2000_v56, %v2020_v28 }
 0x208   :  { %v2022_v0 = vpack.c.b16 %v2021_v7, %v2014_v42 }
 0x20a   :  { %2306 = vmatmul.mubr.bf16.vlgmr.msra.gmra.mrb[28].mxu1 %v2022_v0 }
 0x2dd   :  { %v2106_v32 = vpop.f32.mrb[28].mxu1 }
 0x2de   :  { %v2107_v49 = vadd.f32 %v2271_v8, %v2106_v32  ;;  %v2307_v44 = vpop.f32.mrb[29].mxu1 }
 0x2df   :  { %v2109_v20 = vpop.f32.mrb[30].mxu1 }
 0x2e0   :  { %2113 = vst [vmem:[#allocation2] sm:$0xff] %v2107_v49  ;;  %v2110_v17 = vadd.f32 %v2271_v8, %v2109_v20  ;;  %v2308_v50 = vpop.f32.mrb[31].mxu1 }
 0x2e2   :  { %2114 = vst [vmem:[#allocation2 + $0x8] sm:$0xff] %v2110_v17 }
 0x2e3   :  { %2418 = shalt.err (!%p2415_p4)
}
 0x2e4   :  { %s2419_s24 = scalar_lea.hbm %s3922_s6, 256 }
 0x2e5   :  { %p2420_p5 = scmp.ne.s32.totalorder %s3922_s6, %s2419_s24  ;;  %p2423_p6 = scmp.lt.u32.totalorder %s2419_s24, %s3922_s6 }
 0x2e7   :  { %p2425_p7 = pnand %p2423_p6, %p2420_p5 }
 0x2e9   :  { %2428 = shalt.err (!%p2425_p7)
}
 0x2ea   :  { %s2438_s27 = smov 128   ;;  %s2439_s28 = smov 8  }
 0x2eb   :  { %2126 = dma.vmem_to_hbm [thread:$0]  %s2121_s15, 256, %s3922_s6, [#allocation3], %s2438_s27, %s2438_s27, %s2439_s28  }
 0x2ec   :  { %2429 = dma.done.wait [#allocation3], 256  }
 0x2ed   :  { %2430 = vsyncadd [#allocation3], 4294967040 }
 0x2ee   :  { %2130 = vsyncpa [#allocation3], 1 }

</bundles_post_ra>
